<compile_context>
chip_gen: v7x
topology: tpu7x:2x2x1
jax: 0.10.0
libtpu: 0.0.40
codegen_flags: <defaults>
</compile_context>

<pallas_src>
import functools

import jax
import jax.numpy as jnp
from jax.experimental import pallas as pl
from jax.experimental.pallas import tpu as pltpu


def _round_up(x, m):
    return (x + m - 1) // m * m


def _pick_tile(q_blocks, cap_blocks):
    """Largest multiple of 128 that divides q_blocks*128 and is <= cap_blocks*128."""
    d = max(min(cap_blocks, q_blocks), 1)
    while q_blocks % d:
        d -= 1
    return d * 128


def _vmem_capacity_bytes():
    """Per-core VMEM capacity; conservative (v7x-sized) fallback."""
    try:
        return int(pltpu.get_tpu_info().vmem_capacity_bytes)
    except Exception:
        return 64 * (1 << 20)


def _gcn_kernel(*refs, apply_w):
    if apply_w:
        adj_ref, feat_ref, w_ref, b_ref, out_ref, acc_ref, den_ref = refs
    else:
        adj_ref, feat_ref, b_ref, out_ref, acc_ref, den_ref = refs
        w_ref = None

    k = pl.program_id(2)

    @pl.when(k == 0)
    def _():
        acc_ref[...] = jnp.zeros_like(acc_ref)
        den_ref[...] = jnp.zeros_like(den_ref)

    adj = adj_ref[...]                               # (TM, TK) stored dtype
    feat = feat_ref[...]                             # (TK, F_pad) compute dtype

    # Row-degree always accumulated in f32 (exact for 0/1 adjacency).
    adj_f32 = adj if adj.dtype == jnp.float32 else adj.astype(jnp.float32)
    den_ref[...] += jnp.sum(adj_f32, axis=1, keepdims=True)

    # Feed the MXU in feat's dtype (bf16 path = single MXU pass); f32 accumulate.
    if adj.dtype == feat.dtype:
        mm_adj = adj
    elif feat.dtype == jnp.float32:
        mm_adj = adj_f32
    else:
        mm_adj = adj.astype(feat.dtype)
    acc_ref[...] += jnp.dot(mm_adj, feat, preferred_element_type=jnp.float32)

    @pl.when(k == pl.num_programs(2) - 1)
    def _():
        inv = pl.reciprocal(den_ref[...] + 1.0, approx=False)   # exact
        normalized = acc_ref[...] * inv                         # (TM, F_pad) f32
        if apply_w:
            res = jnp.dot(normalized, w_ref[...],
                          preferred_element_type=jnp.float32)   # (TM, Fout_pad)
        else:
            res = normalized
        out_ref[...] = (res + b_ref[...]).astype(out_ref.dtype)


def graph_convolution(text, adj, weight, bias=None, *, compute_dtype=jnp.float32):
    """GCN forward: (adj @ (text.float() @ W)) / (adj.sum(-1, keepdims) + 1) [+ bias].

    text:   (B, N, Fin)
    adj:    (B, N, N).  NOTE: bf16 adjacency storage is exact ONLY for 0/1 (or
            small-integer) edge weights; pass f32 for weighted graphs.
    weight: (Fin, Fout), bias: (Fout,) or None.
    compute_dtype: dtype of the adj@feat MXU operands.  float32 (default) keeps
            the PyTorch module's numerics; bfloat16 is an opt-in fast path
            (single-pass MXU, halved feat traffic) with ~bf16 accuracy.
    Returns (B, N, Fout) float32.
    """
    B, N, Fin = text.shape
    Fout = weight.shape[1]

    text32 = text.astype(jnp.float32)            # module semantics: .to(float32)
    weight32 = weight.astype(jnp.float32)

    # Trace-time contraction order.
    apply_w = Fin <= Fout
    if apply_w:
        feat = text32                                           # (B, N, Fin)
        F = Fin
    else:
        feat = jnp.einsum("bnf,fo->bno", text32, weight32)      # (B, N, Fout)
        F = Fout
    feat = feat.astype(compute_dtype)

    F_pad = _round_up(F, 128)
    Fout_pad = _round_up(Fout, 128)
    N_pad = _round_up(N, 128)        # lane granularity only; no round-to-512

    # ---- tile selection (generation / VMEM aware) --------------------------
    adj_item = adj.dtype.itemsize
    feat_item = jnp.dtype(compute_dtype).itemsize

    vmem_cap = _vmem_capacity_bytes()
    if vmem_cap >= 100 * (1 << 20):          # v5e / v6e: 128 MiB VMEM per core
        vmem_limit = 100 * (1 << 20)
        tm_cap, tk_cap = 1024, 2048
    else:                                    # v7x: 64 MiB VMEM per TensorCore
        vmem_limit = 48 * (1 << 20)
        tm_cap, tk_cap = 512, 1024

    q = N_pad // 128
    # v7x megacore: keep >= 2 parallel grid units when batch == 1.
    if B == 1 and q >= 2:
        tm_cap = min(tm_cap, (q // 2) * 128)

    TM = _pick_tile(q, tm_cap // 128)
    TK = _pick_tile(q, tk_cap // 128)

    def _vmem_budget(tm, tk):
        return (2 * tm * tk * adj_item             # adj tile, double buffered
                + 2 * tk * F_pad * feat_item       # feat tile, double buffered
                + tm * F_pad * 4                   # f32 accumulator
                + tm * 128 * 4                     # degree accumulator (lane pad)
                + 2 * tm * Fout_pad * 4            # out tile, double buffered
                + (2 * F_pad * Fout_pad * 4 if apply_w else 0)   # W (safe x2)
                + 2 * 128 * Fout_pad * 4)          # bias row

    budget = int(vmem_limit * 0.8)
    while _vmem_budget(TM, TK) > budget and TK > 128:
        TK = _pick_tile(q, max((TK // 128) // 2, 1))
    while _vmem_budget(TM, TK) > budget and TM > 128:
        TM = _pick_tile(q, max((TM // 128) // 2, 1))

    # ---- padding: only when actually needed (avoid extra HBM copy of adj) --
    pad_n = N_pad - N
    adj_p = adj if pad_n == 0 else jnp.pad(adj, ((0, 0), (0, pad_n), (0, pad_n)))
    pad_f = F_pad - F
    if pad_n or pad_f:
        feat_p = jnp.pad(feat, ((0, 0), (0, pad_n), (0, pad_f)))
    else:
        feat_p = feat

    if bias is None:
        b_p = jnp.zeros((1, Fout_pad), jnp.float32)
    else:
        b_p = jnp.pad(bias.astype(jnp.float32).reshape(1, Fout),
                      ((0, 0), (0, Fout_pad - Fout)))

    def _build_and_call(single_buffer_consts):
        const_kwargs = (dict(pipeline_mode=pl.Buffered(1))
                        if single_buffer_consts else {})
        in_specs = [
            pl.BlockSpec((pl.Squeezed(), TM, TK), lambda b, m, k: (b, m, k)),
            pl.BlockSpec((pl.Squeezed(), TK, F_pad), lambda b, m, k: (b, k, 0)),
        ]
        args = [adj_p, feat_p]
        if apply_w:
            w_p = jnp.pad(weight32, ((0, F_pad - Fin), (0, Fout_pad - Fout)))
            in_specs.append(pl.BlockSpec((F_pad, Fout_pad),
                                         lambda b, m, k: (0, 0), **const_kwargs))
            args.append(w_p)
        in_specs.append(pl.BlockSpec((1, Fout_pad), lambda b, m, k: (0, 0),
                                     **const_kwargs))
        args.append(b_p)

        return pl.pallas_call(
            functools.partial(_gcn_kernel, apply_w=apply_w),
            out_shape=jax.ShapeDtypeStruct((B, N_pad, Fout_pad), jnp.float32),
            grid_spec=pltpu.PrefetchScalarGridSpec(
                num_scalar_prefetch=0,
                grid=(B, N_pad // TM, N_pad // TK),
                in_specs=in_specs,
                out_specs=pl.BlockSpec((pl.Squeezed(), TM, Fout_pad),
                                       lambda b, m, k: (b, m, 0)),
                scratch_shapes=[
                    pltpu.VMEM((TM, F_pad), jnp.float32),   # matmul accumulator
                    pltpu.VMEM((TM, 1), jnp.float32),       # row-degree accumulator
                ],
            ),
            compiler_params=pltpu.CompilerParams(
                dimension_semantics=("parallel", "parallel", "arbitrary"),
                vmem_limit_bytes=vmem_limit,
            ),
        )(*args)

    # W/bias never change across the grid -> single VMEM buffer is enough
    # (frees VMEM on v7x).  Fall back to default double buffering if this
    # Pallas version rejects Buffered(1).
    try:
        out_padded = _build_and_call(True)
    except Exception:
        out_padded = _build_and_call(False)

    return out_padded[:, :N, :Fout]


if __name__ == "__main__":
    key = jax.random.PRNGKey(0)
    k1, k2, k3, k4, k5, k6, k7 = jax.random.split(key, 7)

    # --- case 1: Fin <= Fout (W applied inside the kernel), N needs padding --
    B, N, FIN, FOUT = 2, 16, 16, 32
    text = jax.random.normal(k1, (B, N, FIN), dtype=jnp.float32)
    adj01 = (jax.random.uniform(k2, (B, N, N)) > 0.5).astype(jnp.float32)
    weight = jax.random.normal(k3, (FIN, FOUT), dtype=jnp.float32) * 0.1
    bias = jax.random.normal(k4, (FOUT,), dtype=jnp.float32) * 0.1
    adj = adj01.astype(jnp.bfloat16)   # exact for 0/1; halves adj HBM traffic

    hidden = jnp.einsum("bnf,fo->bno", text, weight)
    denom = jnp.sum(adj01, axis=2, keepdims=True) + 1.0
    ref = jnp.einsum("bnm,bmo->bno", adj01, hidden) / denom + bias

    out = jax.block_until_ready(graph_convolution(text, adj, weight, bias))
    assert out.shape == (B, N, FOUT)
    assert jnp.allclose(out, ref, atol=1e-4, rtol=1e-4), \
        float(jnp.max(jnp.abs(out - ref)))

    # Opt-in bf16 compute path (single-pass MXU matmul) — looser tolerance.
    out_bf16 = jax.block_until_ready(
        graph_convolution(text, adj, weight, bias, compute_dtype=jnp.bfloat16))
    assert jnp.allclose(out_bf16, ref, atol=3e-2, rtol=3e-2), \
        float(jnp.max(jnp.abs(out_bf16 - ref)))

    # --- case 2: Fin > Fout (hidden hoisted), B=1, N already lane aligned ----
    B2, N2, FIN2, FOUT2 = 1, 128, 32, 16
    text2 = jax.random.normal(k5, (B2, N2, FIN2), dtype=jnp.float32)
    adj2 = (jax.random.uniform(k6, (B2, N2, N2)) > 0.8).astype(jnp.float32)
    weight2 = jax.random.normal(k7, (FIN2, FOUT2), dtype=jnp.float32) * 0.1

    hidden2 = jnp.einsum("bnf,fo->bno", text2, weight2)
    denom2 = jnp.sum(adj2, axis=2, keepdims=True) + 1.0
    ref2 = jnp.einsum("bnm,bmo->bno", adj2, hidden2) / denom2

    out2 = jax.block_until_ready(graph_convolution(text2, adj2, weight2, None))
    assert out2.shape == (B2, N2, FOUT2)
    assert jnp.allclose(out2, ref2, atol=1e-4, rtol=1e-4), \
        float(jnp.max(jnp.abs(out2 - ref2)))

    print("KERNEL_OK")
</pallas_src>

<mosaic_0001>
module attributes {stable_mosaic.version = 11 : i64} {
  func.func @_gcn_kernel(%arg0: i32, %arg1: i32, %arg2: i32, %arg3: memref<1x128x128xbf16, #tpu.memory_space<vmem>>, %arg4: memref<1x128x128xf32, #tpu.memory_space<vmem>>, %arg5: memref<128x128xf32, #tpu.memory_space<vmem>>, %arg6: memref<1x128xf32, #tpu.memory_space<vmem>>, %arg7: memref<1x128x128xf32, #tpu.memory_space<vmem>>, %arg8: memref<128x128xf32, #tpu.memory_space<vmem>>, %arg9: memref<128x1xf32, #tpu.memory_space<vmem>>) attributes {dimension_semantics = [#tpu.dimension_semantics<parallel>, #tpu.dimension_semantics<parallel>, #tpu.dimension_semantics<arbitrary>], iteration_bounds = array<i64: 2, 1, 1>, scalar_prefetch = 0 : i64, scratch_operands = 2 : i64, tpu.core_type = #tpu.core_type<tc>, window_params = [{transform_indices = @transform_0, window_bounds = array<i64: 1, 128, 128>}, {transform_indices = @transform_1, window_bounds = array<i64: 1, 128, 128>}, {pipeline_mode = #tpu.pipeline_mode<synchronous>, transform_indices = @transform_2, window_bounds = array<i64: 128, 128>}, {pipeline_mode = #tpu.pipeline_mode<synchronous>, transform_indices = @transform_3, window_bounds = array<i64: 1, 128>}, {transform_indices = @transform_4, window_bounds = array<i64: 1, 128, 128>}]} {
    %c0_i32 = arith.constant 0 : i32
    %0 = arith.cmpi eq, %arg2, %c0_i32 : i32
    %1 = arith.extui %0 : i1 to i32
    %c0_i32_0 = arith.constant 0 : i32
    %2 = arith.cmpi ne, %1, %c0_i32_0 : i32
    scf.if %2 {
      %cst_17 = arith.constant 0.000000e+00 : f32
      %20 = vector.broadcast %cst_17 : f32 to vector<128x128xf32>
      %c0_18 = arith.constant 0 : index
      %c0_19 = arith.constant 0 : index
      %21 = vector.load %arg8[%c0_18, %c0_19] : memref<128x128xf32, #tpu.memory_space<vmem>>, vector<128x128xf32>
      tpu.vector_store %arg8[%c0_18, %c0_19], %20 {strides = array<i32>} : memref<128x128xf32, #tpu.memory_space<vmem>>, vector<128x128xf32>,
      %cst_20 = arith.constant 0.000000e+00 : f32
      %22 = vector.broadcast %cst_20 : f32 to vector<128x1xf32>
      %c0_21 = arith.constant 0 : index
      %c0_22 = arith.constant 0 : index
      %23 = vector.load %arg9[%c0_21, %c0_22] : memref<128x1xf32, #tpu.memory_space<vmem>>, vector<128x1xf32>
      tpu.vector_store %arg9[%c0_21, %c0_22], %22 {strides = array<i32>} : memref<128x1xf32, #tpu.memory_space<vmem>>, vector<128x1xf32>,
    } else {
    }
    %c0 = arith.constant 0 : index
    %c0_1 = arith.constant 0 : index
    %c0_2 = arith.constant 0 : index
    %3 = vector.load %arg3[%c0, %c0_1, %c0_2] : memref<1x128x128xbf16, #tpu.memory_space<vmem>>, vector<1x128x128xbf16>
    %4 = vector.shape_cast %3 : vector<1x128x128xbf16> to vector<128x128xbf16>
    %c0_3 = arith.constant 0 : index
    %c0_4 = arith.constant 0 : index
    %c0_5 = arith.constant 0 : index
    %5 = vector.load %arg4[%c0_3, %c0_4, %c0_5] : memref<1x128x128xf32, #tpu.memory_space<vmem>>, vector<1x128x128xf32>
    %6 = vector.shape_cast %5 : vector<1x128x128xf32> to vector<128x128xf32>
    %7 = arith.extf %4 : vector<128x128xbf16> to vector<128x128xf32>
    %c0_6 = arith.constant 0 : index
    %c0_7 = arith.constant 0 : index
    %8 = vector.load %arg9[%c0_6, %c0_7] : memref<128x1xf32, #tpu.memory_space<vmem>>, vector<128x1xf32>
    %cst = arith.constant dense<0.000000e+00> : vector<128xf32>
    %9 = vector.multi_reduction <add>, %7, %cst [1] : vector<128x128xf32> to vector<128xf32>
    %10 = vector.shape_cast %9 : vector<128xf32> to vector<128x1xf32>
    %11 = arith.addf %8, %10 : vector<128x1xf32>
    %c0_8 = arith.constant 0 : index
    %c0_9 = arith.constant 0 : index
    %12 = vector.load %arg9[%c0_8, %c0_9] : memref<128x1xf32, #tpu.memory_space<vmem>>, vector<128x1xf32>
    tpu.vector_store %arg9[%c0_8, %c0_9], %11 {strides = array<i32>} : memref<128x1xf32, #tpu.memory_space<vmem>>, vector<128x1xf32>,
    %c0_10 = arith.constant 0 : index
    %c0_11 = arith.constant 0 : index
    %13 = vector.load %arg8[%c0_10, %c0_11] : memref<128x128xf32, #tpu.memory_space<vmem>>, vector<128x128xf32>
    %cst_12 = arith.constant dense<0.000000e+00> : vector<128x128xf32>
    %14 = tpu.matmul %7, %6, %cst_12 {dimension_numbers = #tpu.dot_dimension_numbers<[1], [0], [0], [1], [0, 0, 1, 1], [], []>} : vector<128x128xf32>, vector<128x128xf32>, vector<128x128xf32> -> vector<128x128xf32>
    %15 = arith.addf %13, %14 : vector<128x128xf32>
    %c0_13 = arith.constant 0 : index
    %c0_14 = arith.constant 0 : index
    %16 = vector.load %arg8[%c0_13, %c0_14] : memref<128x128xf32, #tpu.memory_space<vmem>>, vector<128x128xf32>
    tpu.vector_store %arg8[%c0_13, %c0_14], %15 {strides = array<i32>} : memref<128x128xf32, #tpu.memory_space<vmem>>, vector<128x128xf32>,
    %c0_i32_15 = arith.constant 0 : i32
    %17 = arith.cmpi eq, %arg2, %c0_i32_15 : i32
    %18 = arith.extui %17 : i1 to i32
    %c0_i32_16 = arith.constant 0 : i32
    %19 = arith.cmpi ne, %18, %c0_i32_16 : i32
    scf.if %19 {
      %c0_17 = arith.constant 0 : index
      %c0_18 = arith.constant 0 : index
      %20 = vector.load %arg9[%c0_17, %c0_18] : memref<128x1xf32, #tpu.memory_space<vmem>>, vector<128x1xf32>
      %cst_19 = arith.constant 1.000000e+00 : f32
      %21 = vector.broadcast %cst_19 : f32 to vector<128x1xf32>
      %22 = arith.addf %20, %21 : vector<128x1xf32>
      %23 = tpu.reciprocal %22 : vector<128x1xf32> -> vector<128x1xf32>
      %c0_20 = arith.constant 0 : index
      %c0_21 = arith.constant 0 : index
      %24 = vector.load %arg8[%c0_20, %c0_21] : memref<128x128xf32, #tpu.memory_space<vmem>>, vector<128x128xf32>
      %25 = vector.broadcast %23 : vector<128x1xf32> to vector<128x128xf32>
      %26 = arith.mulf %24, %25 : vector<128x128xf32>
      %c0_22 = arith.constant 0 : index
      %c0_23 = arith.constant 0 : index
      %27 = vector.load %arg5[%c0_22, %c0_23] : memref<128x128xf32, #tpu.memory_space<vmem>>, vector<128x128xf32>
      %cst_24 = arith.constant dense<0.000000e+00> : vector<128x128xf32>
      %28 = tpu.matmul %26, %27, %cst_24 {dimension_numbers = #tpu.dot_dimension_numbers<[1], [0], [0], [1], [0, 0, 1, 1], [], []>} : vector<128x128xf32>, vector<128x128xf32>, vector<128x128xf32> -> vector<128x128xf32>
      %c0_25 = arith.constant 0 : index
      %c0_26 = arith.constant 0 : index
      %29 = vector.load %arg6[%c0_25, %c0_26] : memref<1x128xf32, #tpu.memory_space<vmem>>, vector<1x128xf32>
      %30 = vector.broadcast %29 : vector<1x128xf32> to vector<128x128xf32>
      %31 = arith.addf %28, %30 : vector<128x128xf32>
      %c0_27 = arith.constant 0 : index
      %c0_28 = arith.constant 0 : index
      %c0_29 = arith.constant 0 : index
      %32 = vector.load %arg7[%c0_27, %c0_28, %c0_29] : memref<1x128x128xf32, #tpu.memory_space<vmem>>, vector<1x128x128xf32>
      %33 = vector.shape_cast %32 : vector<1x128x128xf32> to vector<128x128xf32>
      %34 = vector.shape_cast %31 : vector<128x128xf32> to vector<1x128x128xf32>
      tpu.vector_store %arg7[%c0_27, %c0_28, %c0_29], %34 {strides = array<i32>} : memref<1x128x128xf32, #tpu.memory_space<vmem>>, vector<1x128x128xf32>,
    } else {
    }
    return
  }
  func.func @transform_0(%arg0: i32, %arg1: i32, %arg2: i32) -> (i32, i32, i32) {
    %c0_i32 = arith.constant 0 : i32
    return %arg0, %arg1, %arg2 : i32, i32, i32
  }
  func.func @transform_1(%arg0: i32, %arg1: i32, %arg2: i32) -> (i32, i32, i32) {
    %c0_i32 = arith.constant 0 : i32
    %c0_i32_0 = arith.constant 0 : i32
    return %arg0, %arg2, %c0_i32 : i32, i32, i32
  }
  func.func @transform_2(%arg0: i32, %arg1: i32, %arg2: i32) -> (i32, i32) {
    %c0_i32 = arith.constant 0 : i32
    %c0_i32_0 = arith.constant 0 : i32
    %c0_i32_1 = arith.constant 0 : i32
    return %c0_i32, %c0_i32_0 : i32, i32
  }
  func.func @transform_3(%arg0: i32, %arg1: i32, %arg2: i32) -> (i32, i32) {
    %c0_i32 = arith.constant 0 : i32
    %c0_i32_0 = arith.constant 0 : i32
    %c0_i32_1 = arith.constant 0 : i32
    return %c0_i32, %c0_i32_0 : i32, i32
  }
  func.func @transform_4(%arg0: i32, %arg1: i32, %arg2: i32) -> (i32, i32, i32) {
    %c0_i32 = arith.constant 0 : i32
    %c0_i32_0 = arith.constant 0 : i32
    return %arg0, %arg1, %c0_i32 : i32, i32, i32
  }
}

module attributes {stable_mosaic.version = 11 : i64} {
  func.func @_gcn_kernel(%arg0: i32, %arg1: i32, %arg2: i32, %arg3: memref<1x128x128xbf16, #tpu.memory_space<vmem>>, %arg4: memref<1x128x128xf32, #tpu.memory_space<vmem>>, %arg5: memref<128x128xf32, #tpu.memory_space<vmem>>, %arg6: memref<1x128xf32, #tpu.memory_space<vmem>>, %arg7: memref<1x128x128xf32, #tpu.memory_space<vmem>>, %arg8: memref<128x128xf32, #tpu.memory_space<vmem>>, %arg9: memref<128x1xf32, #tpu.memory_space<vmem>>) attributes {dimension_semantics = [#tpu.dimension_semantics<parallel>, #tpu.dimension_semantics<parallel>, #tpu.dimension_semantics<arbitrary>], iteration_bounds = array<i64: 2, 1, 1>, scalar_prefetch = 0 : i64, scratch_operands = 2 : i64, tpu.core_type = #tpu.core_type<tc>, window_params = [{transform_indices = @transform_0, window_bounds = array<i64: 1, 128, 128>}, {transform_indices = @transform_1, window_bounds = array<i64: 1, 128, 128>}, {pipeline_mode = #tpu.pipeline_mode<synchronous>, transform_indices = @transform_2, window_bounds = array<i64: 128, 128>}, {pipeline_mode = #tpu.pipeline_mode<synchronous>, transform_indices = @transform_3, window_bounds = array<i64: 1, 128>}, {transform_indices = @transform_4, window_bounds = array<i64: 1, 128, 128>}]} {
    %c0_i32 = arith.constant 0 : i32
    %0 = arith.cmpi eq, %arg2, %c0_i32 : i32
    %1 = arith.extui %0 : i1 to i32
    %c0_i32_0 = arith.constant 0 : i32
    %2 = arith.cmpi ne, %1, %c0_i32_0 : i32
    scf.if %2 {
      %cst_17 = arith.constant 0.000000e+00 : f32
      %20 = vector.broadcast %cst_17 : f32 to vector<128x128xf32>
      %c0_18 = arith.constant 0 : index
      %c0_19 = arith.constant 0 : index
      %21 = vector.load %arg8[%c0_18, %c0_19] : memref<128x128xf32, #tpu.memory_space<vmem>>, vector<128x128xf32>
      tpu.vector_store %arg8[%c0_18, %c0_19], %20 {strides = array<i32>} : memref<128x128xf32, #tpu.memory_space<vmem>>, vector<128x128xf32>,
      %cst_20 = arith.constant 0.000000e+00 : f32
      %22 = vector.broadcast %cst_20 : f32 to vector<128x1xf32>
      %c0_21 = arith.constant 0 : index
      %c0_22 = arith.constant 0 : index
      %23 = vector.load %arg9[%c0_21, %c0_22] : memref<128x1xf32, #tpu.memory_space<vmem>>, vector<128x1xf32>
      tpu.vector_store %arg9[%c0_21, %c0_22], %22 {strides = array<i32>} : memref<128x1xf32, #tpu.memory_space<vmem>>, vector<128x1xf32>,
    } else {
    }
    %c0 = arith.constant 0 : index
    %c0_1 = arith.constant 0 : index
    %c0_2 = arith.constant 0 : index
    %3 = vector.load %arg3[%c0, %c0_1, %c0_2] : memref<1x128x128xbf16, #tpu.memory_space<vmem>>, vector<1x128x128xbf16>
    %4 = vector.shape_cast %3 : vector<1x128x128xbf16> to vector<128x128xbf16>
    %c0_3 = arith.constant 0 : index
    %c0_4 = arith.constant 0 : index
    %c0_5 = arith.constant 0 : index
    %5 = vector.load %arg4[%c0_3, %c0_4, %c0_5] : memref<1x128x128xf32, #tpu.memory_space<vmem>>, vector<1x128x128xf32>
    %6 = vector.shape_cast %5 : vector<1x128x128xf32> to vector<128x128xf32>
    %7 = arith.extf %4 : vector<128x128xbf16> to vector<128x128xf32>
    %c0_6 = arith.constant 0 : index
    %c0_7 = arith.constant 0 : index
    %8 = vector.load %arg9[%c0_6, %c0_7] : memref<128x1xf32, #tpu.memory_space<vmem>>, vector<128x1xf32>
    %cst = arith.constant dense<0.000000e+00> : vector<128xf32>
    %9 = vector.multi_reduction <add>, %7, %cst [1] : vector<128x128xf32> to vector<128xf32>
    %10 = vector.shape_cast %9 : vector<128xf32> to vector<128x1xf32>
    %11 = arith.addf %8, %10 : vector<128x1xf32>
    %c0_8 = arith.constant 0 : index
    %c0_9 = arith.constant 0 : index
    %12 = vector.load %arg9[%c0_8, %c0_9] : memref<128x1xf32, #tpu.memory_space<vmem>>, vector<128x1xf32>
    tpu.vector_store %arg9[%c0_8, %c0_9], %11 {strides = array<i32>} : memref<128x1xf32, #tpu.memory_space<vmem>>, vector<128x1xf32>,
    %c0_10 = arith.constant 0 : index
    %c0_11 = arith.constant 0 : index
    %13 = vector.load %arg8[%c0_10, %c0_11] : memref<128x128xf32, #tpu.memory_space<vmem>>, vector<128x128xf32>
    %cst_12 = arith.constant dense<0.000000e+00> : vector<128x128xf32>
    %14 = tpu.matmul %7, %6, %cst_12 {dimension_numbers = #tpu.dot_dimension_numbers<[1], [0], [0], [1], [0, 0, 1, 1], [], []>} : vector<128x128xf32>, vector<128x128xf32>, vector<128x128xf32> -> vector<128x128xf32>
    %15 = arith.addf %13, %14 : vector<128x128xf32>
    %c0_13 = arith.constant 0 : index
    %c0_14 = arith.constant 0 : index
    %16 = vector.load %arg8[%c0_13, %c0_14] : memref<128x128xf32, #tpu.memory_space<vmem>>, vector<128x128xf32>
    tpu.vector_store %arg8[%c0_13, %c0_14], %15 {strides = array<i32>} : memref<128x128xf32, #tpu.memory_space<vmem>>, vector<128x128xf32>,
    %c0_i32_15 = arith.constant 0 : i32
    %17 = arith.cmpi eq, %arg2, %c0_i32_15 : i32
    %18 = arith.extui %17 : i1 to i32
    %c0_i32_16 = arith.constant 0 : i32
    %19 = arith.cmpi ne, %18, %c0_i32_16 : i32
    scf.if %19 {
      %c0_17 = arith.constant 0 : index
      %c0_18 = arith.constant 0 : index
      %20 = vector.load %arg9[%c0_17, %c0_18] : memref<128x1xf32, #tpu.memory_space<vmem>>, vector<128x1xf32>
      %cst_19 = arith.constant 1.000000e+00 : f32
      %21 = vector.broadcast %cst_19 : f32 to vector<128x1xf32>
      %22 = arith.addf %20, %21 : vector<128x1xf32>
      %23 = tpu.reciprocal %22 : vector<128x1xf32> -> vector<128x1xf32>
      %c0_20 = arith.constant 0 : index
      %c0_21 = arith.constant 0 : index
      %24 = vector.load %arg8[%c0_20, %c0_21] : memref<128x128xf32, #tpu.memory_space<vmem>>, vector<128x128xf32>
      %25 = vector.broadcast %23 : vector<128x1xf32> to vector<128x128xf32>
      %26 = arith.mulf %24, %25 : vector<128x128xf32>
      %c0_22 = arith.constant 0 : index
      %c0_23 = arith.constant 0 : index
      %27 = vector.load %arg5[%c0_22, %c0_23] : memref<128x128xf32, #tpu.memory_space<vmem>>, vector<128x128xf32>
      %cst_24 = arith.constant dense<0.000000e+00> : vector<128x128xf32>
      %28 = tpu.matmul %26, %27, %cst_24 {dimension_numbers = #tpu.dot_dimension_numbers<[1], [0], [0], [1], [0, 0, 1, 1], [], []>} : vector<128x128xf32>, vector<128x128xf32>, vector<128x128xf32> -> vector<128x128xf32>
      %c0_25 = arith.constant 0 : index
      %c0_26 = arith.constant 0 : index
      %29 = vector.load %arg6[%c0_25, %c0_26] : memref<1x128xf32, #tpu.memory_space<vmem>>, vector<1x128xf32>
      %30 = vector.broadcast %29 : vector<1x128xf32> to vector<128x128xf32>
      %31 = arith.addf %28, %30 : vector<128x128xf32>
      %c0_27 = arith.constant 0 : index
      %c0_28 = arith.constant 0 : index
      %c0_29 = arith.constant 0 : index
      %32 = vector.load %arg7[%c0_27, %c0_28, %c0_29] : memref<1x128x128xf32, #tpu.memory_space<vmem>>, vector<1x128x128xf32>
      %33 = vector.shape_cast %32 : vector<1x128x128xf32> to vector<128x128xf32>
      %34 = vector.shape_cast %31 : vector<128x128xf32> to vector<1x128x128xf32>
      tpu.vector_store %arg7[%c0_27, %c0_28, %c0_29], %34 {strides = array<i32>} : memref<1x128x128xf32, #tpu.memory_space<vmem>>, vector<1x128x128xf32>,
    } else {
    }
    return
  }
  func.func @transform_0(%arg0: i32, %arg1: i32, %arg2: i32) -> (i32, i32, i32) {
    %c0_i32 = arith.constant 0 : i32
    return %arg0, %arg1, %arg2 : i32, i32, i32
  }
  func.func @transform_1(%arg0: i32, %arg1: i32, %arg2: i32) -> (i32, i32, i32) {
    %c0_i32 = arith.constant 0 : i32
    %c0_i32_0 = arith.constant 0 : i32
    return %arg0, %arg2, %c0_i32 : i32, i32, i32
  }
  func.func @transform_2(%arg0: i32, %arg1: i32, %arg2: i32) -> (i32, i32) {
    %c0_i32 = arith.constant 0 : i32
    %c0_i32_0 = arith.constant 0 : i32
    %c0_i32_1 = arith.constant 0 : i32
    return %c0_i32, %c0_i32_0 : i32, i32
  }
  func.func @transform_3(%arg0: i32, %arg1: i32, %arg2: i32) -> (i32, i32) {
    %c0_i32 = arith.constant 0 : i32
    %c0_i32_0 = arith.constant 0 : i32
    %c0_i32_1 = arith.constant 0 : i32
    return %c0_i32, %c0_i32_0 : i32, i32
  }
  func.func @transform_4(%arg0: i32, %arg1: i32, %arg2: i32) -> (i32, i32, i32) {
    %c0_i32 = arith.constant 0 : i32
    %c0_i32_0 = arith.constant 0 : i32
    return %arg0, %arg1, %c0_i32 : i32, i32, i32
  }
}

</mosaic_0001>

<bundles_post_ra>
// kernel: tpu_custom_call.1
= control target key start
LH: loop header
LB: loop body
LE: loop exit
PB: predicated region body
PF: predicated region fallthrough
CT: control target
= control target key end

     0   :  { %s2184_s0 = inlined_call_operand.hbm [shape: bf16[2,128,128], index: 0, kind: input, shape index: {}]   ;;  %s2185_s1 = inlined_call_operand.hbm [shape: f32[2,128,128], index: 1, kind: input, shape index: {}]   ;;  %s2186_s2 = inlined_call_operand.hbm [shape: f32[128,128], index: 2, kind: input, shape index: {}]   ;;  %s2187_s3 = inlined_call_operand.vmem [shape: f32[1,128], index: 3, kind: input, shape index: {}]   ;;  %s2188_s4 = inlined_call_operand.hbm [shape: f32[2,128,128], index: 4, kind: output, shape index: {}]  }
   0x1   :  { %2195 = sst [smem:[#allocation17_spill]] %s2184_s0 }
   0x2   :  { %2196 = sst [smem:[#allocation18_spill]] %s2186_s2 }
   0x3   :  { %9 = vsyncpa [#allocation5], 0 }
   0x4   :  { %11 = vsyncpa [#allocation5 + $0x1], 0 }
   0x5   :  { %12 = vsyncpa [#allocation8], 0 }
   0x6   :  { %14 = vsyncpa [#allocation8 + $0x1], 0 }
   0x7   :  { %15 = vsyncpa [#allocation6], 0 }
   0x8   :  { %17 = vsyncpa [#allocation6 + $0x1], 0  ;;  %s1794_s15 = smov 0   ;;  %s1796_s16 = smov 0  }
   0x9   :  { %s1798_s17 = smov 0   ;;  %s1800_s18 = smov 0  }
   0xa   :  { %s1802_s19 = smov 0   ;;  %s1804_s20 = smov 0  }
   0xb LB: > { %s1825_s21 = sadd.s32 4294967295, %s1755_s20   ;;  %s1154_s22 = sadd.s32 4294967294, %s1755_s20   ;;  %s1755_s20 = sphi %s1804_s20, %s23_s20   ;;  %s1751_s19 = sphi %s1802_s19, %s2224_s19   ;;  %s1747_s18 = sphi %s1800_s18, %s2223_s18   ;;  %s1743_s17 = sphi %s1798_s17, %s2222_s17   ;;  %s1739_s16 = sphi %s1796_s16, %s2221_s16   ;;  %s1735_s15 = sphi %s1794_s15, %s2220_s15  }
   0xc   : > { %p66_p0 = scmp.ne.s32.totalorder %s1739_s16, %s1735_s15  ;;  %p2189_p1 = scmp.eq.s32.totalorder %s1825_s21, 0 }
   0xd   : > { %p168_p3 = scmp.eq.s32.totalorder %s1154_s22, 1  ;;  %p1155_p5 = scmp.ge.s32.totalorder %s1755_s20, 1 }
   0xe   : > { %p1834_p4 = por %p2189_p1, %p66_p0  ;;  %p175_p7 = scmp.lt.s32.totalorder %s1755_s20, 3 }
   0xf   : > { %p1839_p6 = por %p168_p3, %p66_p0  ;;  %s1757_s26 = smov [#allocation9]  }
  0x10   : > { %s2197_s23 = scalar_select %p1834_p4, 1, 0 }
  0x11   : > { %s2198_s24 = scalar_select %p1839_p6, 1, 0 }
  0x12   : > { %p1844_p8 = pnand %p1155_p5, %p175_p7  ;;  %s187_s27 = sshll.u32 %s1757_s26, 4  ;;  %s188_s27 = int_to_ptr.vmem [resolvable:$true] %s187_s27 }
  0x13   : > { %s42_s29 = sadd.s32 1, %s1751_s19  ;;  %s2201_s2 = sld [smem:[#allocation18_spill]] }
  0x14   : > { %s2199_s25 = scalar_select %p1844_p8, 1, 0 }
  0x15   : > { %p1467_p9 = pneg %p1844_p8 }
  0x17   : > { %p1853_p11 = pnand %p1467_p9, %p2189_p1 }
  0x19   : > { %s1577_s6 = scalar_lea.hbm %s2201_s2, 2048  ;;  %p1579_p13 = pneg %p1853_p11 }
  0x1a   : > { %p1578_p12 = scmp.ne.s32.totalorder %s2201_s2, %s1577_s6  ;;  %p1584_p5 = scmp.lt.u32.totalorder %s1577_s6, %s2201_s2 }
  0x1c   : > { %p1580_p0 = pnand %p1579_p13, %p1578_p12 }
  0x1e   : > { %p1581_p3 = pneg %p1580_p0 }
  0x20   : > { %p1586_p7 = pnand %p1584_p5, %p1581_p3 }
  0x22   : > { %1589 = shalt.err (!%p1586_p7)
}
  0x23   : > { %s1590_s11 = scalar_lea.vmem %s188_s27, 2048  ;;  %p1598_p2 = scmp.lt.s32.totalorder %s188_s27, %s188_s27 }
  0x24   : > { %p1591_p9 = scmp.ne.s32.totalorder %s188_s27, %s1590_s11  ;;  %p1599_p6 = scmp.lt.s32.totalorder %s1590_s11, %s1590_s11 }
  0x26   : > { %p1593_p10 = pnand %p1591_p9, %p1579_p13  ;;  %p1600_p4 = por %p1599_p6, %p1598_p2 }
  0x28   : > { %p1594_p1 = pneg %p1593_p10 }
  0x2a   : > { %p1601_p8 = pnand %p1600_p4, %p1594_p1 }
  0x2c   : > { %1604 = shalt.err (!%p1601_p8)
}
  0x2d   : > { %s2192_s12 = smov 128   ;;  %s2193_s13 = smov 8  }
  0x2e   : > { %1470 = dma.hbm_to_vmem [thread:$0]  (!%p1853_p11), %s2201_s2, 2048, %s188_s27, [#allocation8], %s2192_s12, %s2192_s12, %s2193_s13  }
  0x2f   : > { %p44_p1 = scmp.ge.s32.totalorder %s42_s29, 2  ;;  %s53_s26 = sadd.s32 1, %s1743_s17 }
  0x30   : > { %p60_p2 = scmp.ne.s32.totalorder %s1743_s17, %s1739_s16  ;;  %p61_p4 = scmp.eq.s32.totalorder %s1755_s20, 0 }
  0x31   : > { %s2226_s29 = smov (%p44_p1, %s42_s29), 0  ;;  %p2204_p8 = scmp.eq.s32.totalorder %s1825_s21, 1 }
  0x32   : > { %2202 = sst [smem:[#allocation15_spill]] %s2226_s29  ;;  %p1883_p6 = por %p61_p4, %p60_p2 }
  0x33   : > { %p1889_p10 = por %p2204_p8, %p60_p2  ;;  %s46_s5 = ssub.s32 %s1751_s19, %s2226_s29 }
  0x34   : > { %p1483_p11 = scmp.lt.s32.totalorder %s1755_s20, 2  ;;  %p51_p12 = scmp.eq.s32.totalorder %s46_s5, 0 }
  0x35   : > { %s1897_s27 = sand.u32 1, %s1743_s17   ;;  %s1175_s8 = sshll.u32 %s1751_s19, 10 }
  0x36   : > { %s1158_s6 = sshll.u32 %s1897_s27, 6  ;;  %s2207_s0 = sld [smem:[#allocation17_spill]] }
  0x37   : > { %s1901_s7 = scalar_select %p51_p12, %s1743_s17, %s53_s26  }
  0x38   : > { %s208_s14 = scalar_lea.vmem [#allocation4], %s1158_s6  ;;  %p1913_p13 = pnand %p1483_p11, %p1883_p6 }
  0x39   : > { %2206 = sst [smem:[#allocation16_spill]] %s1901_s7  ;;  %s218_s22 = sshll.u32 %s208_s14, 4  ;;  %s1909_s22 = int_to_ptr.vmem [resolvable:$true] %s218_s22 }
  0x3a   : > { %s205_s12 = scalar_lea.sflag [#allocation5], %s1897_s27  ;;  %p1607_p3 = pneg %p1913_p13 }
  0x3c   : > { %s1907_s11 = scalar_lea.hbm %s2207_s0, %s1175_s8  ;;  %s1610_s30 = scalar_lea.hbm %s2207_s0, 2048 }
  0x3d   : > { %s1605_s9 = scalar_lea.hbm %s1907_s11, 1024  ;;  %p1611_p9 = scmp.lt.u32.totalorder %s1907_s11, %s2207_s0 }
  0x3e   : > { %p1606_p0 = scmp.ne.s32.totalorder %s1907_s11, %s1605_s9  ;;  %p1612_p1 = scmp.lt.u32.totalorder %s1610_s30, %s1605_s9 }
  0x3f   : > { %p1614_p4 = scmp.lt.u32.totalorder %s1605_s9, %s1907_s11 }
  0x40   : > { %p1608_p5 = pnand %p1607_p3, %p1606_p0  ;;  %p1613_p2 = por %p1612_p1, %p1611_p9 }
  0x42   : > { %p1609_p7 = pneg %p1608_p5  ;;  %p1615_p6 = por %p1614_p4, %p1613_p2 }
  0x44   : > { %p1616_p8 = pnand %p1615_p6, %p1609_p7 }
  0x46   : > { %1619 = shalt.err (!%p1616_p8)
}
  0x47   : > { %s1620_s13 = scalar_lea.vmem %s1909_s22, 1024  ;;  %s1760_s6 = smov [#allocation4]  }
  0x48   : > { %p1621_p11 = scmp.ne.s32.totalorder %s1909_s22, %s1620_s13  ;;  %s1625_s8 = sshll.u32 %s1760_s6, 4  ;;  %s1626_s8 = int_to_ptr.vmem [resolvable:$false] %s1625_s8 }
  0x49   : > { %s1627_s10 = scalar_lea.vmem %s1626_s8, 2048  ;;  %p1628_p5 = scmp.lt.s32.totalorder %s1909_s22, %s1626_s8 }
  0x4a   : > { %p1623_p12 = pnand %p1621_p11, %p1607_p3  ;;  %p1629_p9 = scmp.lt.s32.totalorder %s1627_s10, %s1620_s13 }
  0x4c   : > { %p1624_p0 = pneg %p1623_p12  ;;  %p1630_p1 = por %p1629_p9, %p1628_p5 }
  0x4e   : > { %p1631_p2 = pnand %p1630_p1, %p1624_p0 }
  0x50   : > { %1634 = shalt.err (!%p1631_p2)
}
  0x51   : > { %s1761_s9 = smov 64   ;;  %s1762_s30 = smov 4  }
  0x52   : > { %1474 = dma.hbm_to_vmem [thread:$0]  (!%p1913_p13), %s1907_s11, 1024, %s1909_s22, %s205_s12, %s1761_s9, %s1761_s9, %s1762_s30  }
  0x53   : > { %s1161_s14 = sshll.u32 %s1897_s27, 7  ;;  %s1176_s6 = sshll.u32 %s1751_s19, 11 }
  0x54   : > { %s1951_s10 = scalar_lea.hbm %s2185_s1, %s1176_s6  ;;  %s232_s26 = scalar_lea.vmem [#allocation7], %s1161_s14 }
  0x55   : > { %s241_s0 = sshll.u32 %s232_s26, 4  ;;  %s2209_s2 = sand.u32 1, %s1755_s20   ;;  %s1953_s0 = int_to_ptr.vmem [resolvable:$true] %s241_s0 }
  0x56   : > { %s1957_s29 = scalar_lea.sflag [#allocation8], %s2209_s2  ;;  %s1635_s7 = scalar_lea.hbm %s1951_s10, 2048 }
  0x57   : > { %p1636_p7 = scmp.ne.s32.totalorder %s1951_s10, %s1635_s7  ;;  %s1640_s11 = scalar_lea.hbm %s2185_s1, 4096 }
  0x58   : > { %p1641_p8 = scmp.lt.u32.totalorder %s1951_s10, %s2185_s1  ;;  %p1642_p11 = scmp.lt.u32.totalorder %s1640_s11, %s1635_s7 }
  0x59   : > { %p1638_p4 = pnand %p1636_p7, %p1607_p3  ;;  %p1644_p0 = scmp.lt.u32.totalorder %s1635_s7, %s1951_s10 }
  0x5a   : > { %p1643_p12 = por %p1642_p11, %p1641_p8 }
  0x5b   : > { %p1639_p6 = pneg %p1638_p4 }
  0x5c   : > { %p1645_p5 = por %p1644_p0, %p1643_p12 }
  0x5e   : > { %p1646_p9 = pnand %p1645_p5, %p1639_p6 }
  0x60   : > { %1649 = shalt.err (!%p1646_p9)
}
  0x61   : > { %s1650_s2 = scalar_lea.vmem %s1953_s0, 2048  ;;  %s1763_s26 = smov [#allocation7]  }
  0x62   : > { %p1651_p1 = scmp.ne.s32.totalorder %s1953_s0, %s1650_s2  ;;  %s1655_s30 = sshll.u32 %s1763_s26, 4  ;;  %s1656_s30 = int_to_ptr.vmem [resolvable:$false] %s1655_s30 }
  0x63   : > { %s1657_s14 = scalar_lea.vmem %s1656_s30, 4096  ;;  %p1658_p4 = scmp.lt.s32.totalorder %s1953_s0, %s1656_s30 }
  0x64   : > { %p1653_p2 = pnand %p1651_p1, %p1607_p3  ;;  %p1659_p8 = scmp.lt.s32.totalorder %s1657_s14, %s1650_s2 }
  0x66   : > { %p1654_p7 = pneg %p1653_p2  ;;  %p1660_p11 = por %p1659_p8, %p1658_p4 }
  0x68   : > { %p1661_p12 = pnand %p1660_p11, %p1654_p7 }
  0x6a   : > { %1664 = shalt.err (!%p1661_p12)
}
  0x6b   : > { %s2210_s7 = smov 8   ;;  %s2211_s6 = smov 128  }
  0x6c   : > { %1477 = dma.hbm_to_vmem [thread:$0]  (!%p1913_p13), %s1951_s10, 2048, %s1953_s0, %s1957_s29, %s2211_s6, %s2211_s6, %s2210_s7  }
  0x6d   : > { %p2212_p3 = scmp.ne.s32.totalorder %s2199_s25, 0 }
  0x6e   : > { %s1989_s8 = sand.u32 (!%p2212_p3), 1, %s1739_s16   ;;  %p2213_p6 = scmp.ne.s32.totalorder (!%p2212_p3), %s2197_s23, 0 }
  0x6f   : > { %253 = sbr.rel (%p2212_p3) target bundleno = 698 (0x2ba), region = 36  ;;  %s1165_s13 = sshll.u32 (!%p2212_p3), %s1989_s8, 6 }
  0x70   : > { %s256_s12 = scalar_lea.sflag (!%p2212_p3), [#allocation5], %s1989_s8  ;;  %s1993_s27 = scalar_lea.vmem (!%p2212_p3), [#allocation4], %s1165_s13 }
  0x76   : > { %1718 = dma.done.wait (%p2213_p6), %s256_s12, 1024  }
  0x77   : > { %1720 = vsyncadd (%p2213_p6), %s256_s12, 4294966272  ;;  %s264_s0 = sand.u32 1, %s1825_s21   ;;  %s1166_s25 = sshll.u32 %s1989_s8, 7 }
  0x78   : > { %s265_s29 = scalar_lea.sflag [#allocation8], %s264_s0  ;;  %s2003_s5 = scalar_lea.vmem [#allocation7], %s1166_s25 }
  0x79   : > { %1722 = dma.done.wait (%p2213_p6), %s265_s29, 2048  }
  0x7a   : > { %1724 = vsyncadd (%p2213_p6), %s265_s29, 4294965248  ;;  %p2214_p13 = scmp.eq.s32.totalorder %s1825_s21, 0 }
  0x7c   : > { %1726 = dma.done.wait (%p2214_p13), [#allocation8], 2048   ;;  %p2215_p0 = pmov %p2214_p13 }
  0x7d   : > { %vm325_vm0 = vcmask 7168   ;;  %v1764_v0 = vmov 0.0   ;;  %v2030_v1 = vld [vmem:[%s1993_s27 + $0x8] sm:$0xff]   ;;  %v2033_v2 = vld [vmem:[%s1993_s27] sm:$0xff]   ;;  %v360_v9 = vld [vmem:[%s2003_s5 + $0x10] sm:$0xff]  ;;  %v1765_v49 = vmov 0  }
  0x7e   : > { %1728 = vsyncadd (%p2215_p0), [#allocation8], 4294965248  ;;  %328 = vst.msk [vmem:[#allocation3 + $0x10] sm:$0xff] %vm325_vm0, %v1764_v0  ;;  %v1184_v3 = vunpack.c.l.bf16 %v2030_v1  ;;  %v1180_v4 = vunpack.c.l.bf16 %v2033_v2  ;;  %v358_v5 = vld [vmem:[%s2003_s5] sm:$0xff]  ;;  %v1185_v6 = vunpack.c.h.bf16 %v2030_v1  ;;  %v1181_v7 = vunpack.c.h.bf16 %v2033_v2  ;;  %v359_v8 = vld [vmem:[%s2003_s5 + $0x8] sm:$0xff]  ;;  %1543 = vset.pattern.permute.xlu0 %v1765_v49  ;;  %1544 = vset.pattern.permute.xlu1 %v1765_v49  ;;  %s2110_s10 = scalar_lea.vmem [#allocation10], %s1166_s25 }
  0x7f   : > { %326 = vst.msk [vmem:[#allocation3] sm:$0xff] %vm325_vm0, %v1764_v0  ;;  %327 = vst.msk [vmem:[#allocation3 + $0x8] sm:$0xff] %vm325_vm0, %v1764_v0  ;;  %v361_v10 = vld [vmem:[%s2003_s5 + $0x18] sm:$0xff]  ;;  %v2046_v11 = vld [vmem:[%s1993_s27 + $0x10] sm:$0xff]   ;;  %v1393_v12 = vpack.c.bf16 %v359_v8, %v358_v5  ;;  %s1177_s11 = sshll.u32 %s1747_s18, 11  ;;  %s1027_s22 = sshll.u32 %s2110_s10, 4  ;;  %s2133_s22 = int_to_ptr.vmem [resolvable:$true] %s1027_s22 }
  0x80   : > { %329 = vst.msk [vmem:[#allocation3 + $0x18] sm:$0xff] %vm325_vm0, %v1764_v0  ;;  %330 = vst.msk [vmem:[#allocation3 + $0x20] sm:$0xff] %vm325_vm0, %v1764_v0  ;;  %410 = vadd.xlane.f32.xlu1 %v1184_v3  ;;  %406 = vadd.xlane.f32.xlu0 %v1180_v4  ;;  %v1397_v13 = vpack.c.bf16 %v361_v10, %v360_v9  ;;  %v1189_v14 = vunpack.c.h.bf16 %v2046_v11  ;;  %v1188_v15 = vunpack.c.l.bf16 %v2046_v11  ;;  %v362_v16 = vld [vmem:[%s2003_s5 + $0x20] sm:$0xff]  ;;  %v363_v17 = vld [vmem:[%s2003_s5 + $0x28] sm:$0xff]  ;;  %s2131_s26 = scalar_lea.hbm %s2188_s4, %s1177_s11  ;;  %s1012_s18 = scalar_lea.sflag [#allocation6], %s1989_s8 }
  0x81   : > { %331 = vst.msk [vmem:[#allocation3 + $0x28] sm:$0xff] %vm325_vm0, %v1764_v0  ;;  %332 = vst.msk [vmem:[#allocation3 + $0x30] sm:$0xff] %vm325_vm0, %v1764_v0  ;;  %1313 = vmatprep.mubr.f32.mxu0 %v1180_v4  ;;  %v2057_v18 = vld [vmem:[%s1993_s27 + $0x18] sm:$0xff]   ;;  %1394 = vmatprep.subr.bf16.mxu0 %v1393_v12  ;;  %v1401_v19 = vpack.c.bf16 %v363_v17, %v362_v16  ;;  %v364_v22 = vld [vmem:[%s2003_s5 + $0x30] sm:$0xff]  ;;  %s1665_s30 = scalar_lea.vmem %s2133_s22, 2048  ;;  %s1766_s14 = smov [#allocation10]  }
  0x82   : > { %333 = vst.msk [vmem:[#allocation3 + $0x38] sm:$0xff] %vm325_vm0, %v1764_v0  ;;  %334 = vst.msk [vmem:[#allocation3 + $0x40] sm:$0xff] %vm325_vm0, %v1764_v0  ;;  %1396 = vmatpush3.bf16.msra.mxu0 %v1393_v12  ;;  %v1193_v20 = vunpack.c.h.bf16 %v2057_v18  ;;  %v1192_v21 = vunpack.c.l.bf16 %v2057_v18  ;;  %v365_v23 = vld [vmem:[%s2003_s5 + $0x38] sm:$0xff]  ;;  %v1213_v24 = vld [vmem:[%s1993_s27 + $0x20] sm:$0xff]   ;;  %p1666_p5 = scmp.ne.s32.totalorder %s2133_s22, %s1665_s30  ;;  %s1669_s7 = sshll.u32 %s1766_s14, 4  ;;  %s1670_s7 = int_to_ptr.vmem [resolvable:$false] %s1669_s7 }
  0x83   : > { %335 = vst.msk [vmem:[#allocation3 + $0x48] sm:$0xff] %vm325_vm0, %v1764_v0  ;;  %336 = vst.msk [vmem:[#allocation3 + $0x50] sm:$0xff] %vm325_vm0, %v1764_v0  ;;  %1398 = vmatprep.subr.bf16.mxu0 %v1397_v13  ;;  %v1405_v25 = vpack.c.bf16 %v365_v23, %v364_v22  ;;  %v1197_v26 = vunpack.c.h.bf16 %v1213_v24  ;;  %v1196_v27 = vunpack.c.l.bf16 %v1213_v24  ;;  %v366_v28 = vld [vmem:[%s2003_s5 + $0x40] sm:$0xff]  ;;  %v367_v29 = vld [vmem:[%s2003_s5 + $0x48] sm:$0xff]  ;;  %s1671_s6 = scalar_lea.vmem %s1670_s7, 4096  ;;  %p1672_p2 = scmp.lt.s32.totalorder %s2133_s22, %s1670_s7 }
  0x84   : > { %337 = vst.msk [vmem:[#allocation3 + $0x58] sm:$0xff] %vm325_vm0, %v1764_v0  ;;  %338 = vst.msk [vmem:[#allocation3 + $0x60] sm:$0xff] %vm325_vm0, %v1764_v0  ;;  %412 = vadd.xlane.f32.xlu1 %v1185_v6  ;;  %408 = vadd.xlane.f32.xlu0 %v1181_v7  ;;  %v1214_v30 = vld [vmem:[%s1993_s27 + $0x28] sm:$0xff]   ;;  %v1409_v31 = vpack.c.bf16 %v367_v29, %v366_v28  ;;  %v368_v34 = vld [vmem:[%s2003_s5 + $0x50] sm:$0xff]  ;;  %p1667_p9 = pnand %p1666_p5, %p1889_p10  ;;  %p1673_p7 = scmp.lt.s32.totalorder %s1671_s6, %s1665_s30 }
  0x85   : > { %339 = vst.msk [vmem:[#allocation3 + $0x68] sm:$0xff] %vm325_vm0, %v1764_v0  ;;  %340 = vst.msk [vmem:[#allocation3 + $0x70] sm:$0xff] %vm325_vm0, %v1764_v0  ;;  %v1201_v32 = vunpack.c.h.bf16 %v1214_v30  ;;  %v1200_v33 = vunpack.c.l.bf16 %v1214_v30  ;;  %v369_v35 = vld [vmem:[%s2003_s5 + $0x58] sm:$0xff]  ;;  %v1215_v36 = vld [vmem:[%s1993_s27 + $0x30] sm:$0xff]  }
  0x86   : > { %341 = vst.msk [vmem:[#allocation3 + $0x78] sm:$0xff] %vm325_vm0, %v1764_v0  ;;  %1400 = vmatpush3.bf16.msra.mxu0 %v1397_v13  ;;  %v1413_v37 = vpack.c.bf16 %v369_v35, %v368_v34  ;;  %v1205_v38 = vunpack.c.h.bf16 %v1215_v36  ;;  %v1204_v39 = vunpack.c.l.bf16 %v1215_v36  ;;  %v370_v40 = vld [vmem:[%s2003_s5 + $0x60] sm:$0xff]  ;;  %v371_v41 = vld [vmem:[%s2003_s5 + $0x68] sm:$0xff]  ;;  %v1216_v42 = vld [vmem:[%s1993_s27 + $0x38] sm:$0xff]   ;;  %p1668_p1 = pneg %p1667_p9  ;;  %p1674_p4 = por %p1673_p7, %p1672_p2 }
  0x87   : > { %1402 = vmatprep.subr.bf16.mxu0 %v1401_v19  ;;  %v1417_v43 = vpack.c.bf16 %v371_v41, %v370_v40  ;;  %v1209_v44 = vunpack.c.h.bf16 %v1216_v42  ;;  %v1208_v45 = vunpack.c.l.bf16 %v1216_v42  ;;  %v372_v46 = vld [vmem:[%s2003_s5 + $0x70] sm:$0xff]  ;;  %v373_v47 = vld [vmem:[%s2003_s5 + $0x78] sm:$0xff]  ;;  %v827_v50 = vld [vmem:[#allocation9] sm:$0xff] }
  0x88   : > { %416 = vadd.xlane.f32.xlu1 %v1189_v14  ;;  %414 = vadd.xlane.f32.xlu0 %v1188_v15  ;;  %v1421_v48 = vpack.c.bf16 %v373_v47, %v372_v46  ;;  %v828_v51 = vld [vmem:[#allocation9 + $0x8] sm:$0xff]  ;;  %v829_v52 = vld [vmem:[#allocation9 + $0x10] sm:$0xff]  ;;  %v830_v54 = vld [vmem:[#allocation9 + $0x18] sm:$0xff]  ;;  %p1675_p8 = pnand %p1674_p4, %p1668_p1 }
  0x89   : > { %v1425_v53 = vpack.c.bf16 %v828_v51, %v827_v50  ;;  %v1429_v55 = vpack.c.bf16 %v830_v54, %v829_v52  ;;  %v831_v56 = vld [vmem:[#allocation9 + $0x20] sm:$0xff]  ;;  %v832_v57 = vld [vmem:[#allocation9 + $0x28] sm:$0xff]  ;;  %v833_v59 = vld [vmem:[#allocation9 + $0x30] sm:$0xff] }
  0x8a   : > { %1404 = vmatpush3.bf16.msra.mxu0 %v1401_v19  ;;  %v1433_v58 = vpack.c.bf16 %v832_v57, %v831_v56  ;;  %v834_v60 = vld [vmem:[#allocation9 + $0x38] sm:$0xff]  ;;  %v835_v62 = vld [vmem:[#allocation9 + $0x40] sm:$0xff]  ;;  %v836_v63 = vld [vmem:[#allocation9 + $0x48] sm:$0xff] }
  0x8b   : > { %1406 = vmatprep.subr.bf16.mxu0 %v1405_v25  ;;  %1426 = vmatprep.subr.bf16.mxu1 %v1425_v53  ;;  %v1437_v61 = vpack.c.bf16 %v834_v60, %v833_v59  ;;  %v1441_v0 = vpack.c.bf16 %v836_v63, %v835_v62  ;;  %v837_v1 = vld [vmem:[#allocation9 + $0x50] sm:$0xff]  ;;  %v838_v2 = vld [vmem:[#allocation9 + $0x58] sm:$0xff]  ;;  %v839_v4 = vld [vmem:[#allocation9 + $0x60] sm:$0xff] }
  0x8c   : > { %420 = vadd.xlane.f32.xlu1 %v1193_v20  ;;  %418 = vadd.xlane.f32.xlu0 %v1192_v21  ;;  %v840_v5 = vld [vmem:[#allocation9 + $0x68] sm:$0xff]  ;;  %v390_v8 = vld [vmem:[#allocation3] sm:$0xff]  ;;  %v393_v13 = vld [vmem:[#allocation3 + $0x18] sm:$0xff] }
  0x8d   : > { %1428 = vmatpush3.bf16.msra.mxu1 %v1425_v53  ;;  %v395_v19 = vld [vmem:[#allocation3 + $0x28] sm:$0xff]  ;;  %v398_v36 = vld [vmem:[#allocation3 + $0x40] sm:$0xff]  ;;  %v841_v56 = vld [vmem:[#allocation9 + $0x70] sm:$0xff] }
  0x8e   : > { %1408 = vmatpush3.bf16.msra.mxu0 %v1405_v25  ;;  %1430 = vmatprep.subr.bf16.mxu1 %v1429_v55  ;;  %v397_v25 = vld [vmem:[#allocation3 + $0x38] sm:$0xff]  ;;  %v399_v34 = vld [vmem:[#allocation3 + $0x48] sm:$0xff]  ;;  %v402_v53 = vld [vmem:[#allocation3 + $0x60] sm:$0xff] }
  0x8f   : > { %1410 = vmatprep.subr.bf16.mxu0 %v1409_v31  ;;  %v403_v52 = vld [vmem:[#allocation3 + $0x68] sm:$0xff]  ;;  %v842_v57 = vld [vmem:[#allocation9 + $0x78] sm:$0xff] }
  0x90   : > { %424 = vadd.xlane.f32.xlu1 %v1197_v26  ;;  %422 = vadd.xlane.f32.xlu0 %v1196_v27 }
  0x91   : > { %1432 = vmatpush3.bf16.msra.mxu1 %v1429_v55 }
  0x92   : > { %1412 = vmatpush3.bf16.msra.mxu0 %v1409_v31  ;;  %1434 = vmatprep.subr.bf16.mxu1 %v1433_v58 }
  0x93   : > { %1414 = vmatprep.subr.bf16.mxu0 %v1413_v37 }
  0x94   : > { %428 = vadd.xlane.f32.xlu1 %v1201_v32  ;;  %426 = vadd.xlane.f32.xlu0 %v1200_v33 }
  0x95   : > { %1436 = vmatpush3.bf16.msra.mxu1 %v1433_v58 }
  0x96   : > { %1416 = vmatpush3.bf16.msra.mxu0 %v1413_v37  ;;  %1438 = vmatprep.subr.bf16.mxu1 %v1437_v61 }
  0x97   : > { %1418 = vmatprep.subr.bf16.mxu0 %v1417_v43 }
  0x98   : > { %432 = vadd.xlane.f32.xlu1 %v1205_v38  ;;  %430 = vadd.xlane.f32.xlu0 %v1204_v39 }
  0x99   : > { %1440 = vmatpush3.bf16.msra.mxu1 %v1437_v61  ;;  %v1453_v61 = vpack.c.bf16 %v842_v57, %v841_v56 }
  0x9a   : > { %1420 = vmatpush3.bf16.msra.mxu0 %v1417_v43  ;;  %1442 = vmatprep.subr.bf16.mxu1 %v1441_v0 }
  0x9b   : > { %1422 = vmatprep.subr.bf16.mxu0 %v1421_v48 }
  0x9c   : > { %436 = vadd.xlane.f32.xlu1 %v1209_v44  ;;  %434 = vadd.xlane.f32.xlu0 %v1208_v45 }
  0x9d   : > { %1444 = vmatpush3.bf16.msra.mxu1 %v1441_v0  ;;  %v405_v0 = vld [vmem:[#allocation3 + $0x78] sm:$0xff] }
  0x9e   : > { %1424 = vmatpush3.bf16.msra.mxu0 %v1421_v48 }
  0xa1   : > { %1314 = vmatmul.mubr.f32.vlgmr.msra.gmra.mrb[0].mxu0 %v1181_v7  ;;  %v392_v7 = vld [vmem:[#allocation3 + $0x10] sm:$0xff] }
  0xa2   : > { %1316 = vmatprep.mubr.f32.mxu0 %v1184_v3  ;;  %v1445_v3 = vpack.c.bf16 %v838_v2, %v837_v1  ;;  %v404_v2 = vld [vmem:[#allocation3 + $0x70] sm:$0xff] }
  0xa4   : > { %1446 = vmatprep.subr.bf16.mxu1 %v1445_v3 }
  0xa5   : > { %1317 = vmatmul.mubr.f32.gmra.mrb[2].mxu0 %v1185_v6  ;;  %1448 = vmatpush3.bf16.msra.mxu1 %v1445_v3  ;;  %v1449_v6 = vpack.c.bf16 %v840_v5, %v839_v4 }
  0xa6   : > { %1319 = vmatprep.mubr.f32.mxu0 %v1188_v15 }
  0xa7   : > { %1450 = vmatprep.subr.bf16.mxu1 %v1449_v6 }
  0xa9   : > { %1320 = vmatmul.mubr.f32.gmra.mrb[4].mxu0 %v1189_v14  ;;  %1452 = vmatpush3.bf16.msra.mxu1 %v1449_v6  ;;  %v391_v14 = vld [vmem:[#allocation3 + $0x8] sm:$0xff] }
  0xaa   : > { %1322 = vmatprep.mubr.f32.mxu0 %v1192_v21  ;;  %1454 = vmatprep.subr.bf16.mxu1 %v1453_v61 }
  0xad   : > { %1323 = vmatmul.mubr.f32.gmra.mrb[6].mxu0 %v1193_v20  ;;  %v394_v20 = vld [vmem:[#allocation3 + $0x20] sm:$0xff]  ;;  %1456 = vmatpush3.bf16.msra.mxu1 %v1453_v61 }
  0xae   : > { %1325 = vmatprep.mubr.f32.mxu0 %v1196_v27 }
  0xb1   : > { %1326 = vmatmul.mubr.f32.gmra.mrb[8].mxu0 %v1197_v26  ;;  %v396_v26 = vld [vmem:[#allocation3 + $0x30] sm:$0xff] }
  0xb2   : > { %1328 = vmatprep.mubr.f32.mxu0 %v1200_v33 }
  0xb5   : > { %1329 = vmatmul.mubr.f32.gmra.mrb[10].mxu0 %v1201_v32 }
  0xb6   : > { %1331 = vmatprep.mubr.f32.mxu0 %v1204_v39 }
  0xb9   : > { %1332 = vmatmul.mubr.f32.gmra.mrb[12].mxu0 %v1205_v38 }
  0xba   : > { %1334 = vmatprep.mubr.f32.mxu0 %v1208_v45  ;;  %v400_v45 = vld [vmem:[#allocation3 + $0x50] sm:$0xff] }
  0xbd   : > { %1335 = vmatmul.mubr.f32.gmra.mrb[14].mxu0 %v1209_v44  ;;  %v401_v44 = vld [vmem:[#allocation3 + $0x58] sm:$0xff] }
 0x10d   : > { %v411_v9 = vpop.xlane.xlu1 %410  ;;  %v407_v10 = vpop.xlane.xlu0 %406 }
 0x10e   : > { %v440_v11 = vadd.f32 %v411_v9, %v392_v7  ;;  %v438_v12 = vadd.f32 %v407_v10, %v390_v8 }
 0x110   : > { %457 = vst.msk [vmem:[#allocation3 + $0x10] sm:$0xff] %vm325_vm0, %v440_v11  ;;  %455 = vst.msk [vmem:[#allocation3] sm:$0xff] %vm325_vm0, %v438_v12 }
 0x111   : > { %v413_v15 = vpop.xlane.xlu1 %412  ;;  %v409_v16 = vpop.xlane.xlu0 %408 }
 0x112   : > { %v441_v17 = vadd.f32 %v413_v15, %v393_v13  ;;  %v439_v18 = vadd.f32 %v409_v16, %v391_v14 }
 0x114   : > { %458 = vst.msk [vmem:[#allocation3 + $0x18] sm:$0xff] %vm325_vm0, %v441_v17  ;;  %456 = vst.msk [vmem:[#allocation3 + $0x8] sm:$0xff] %vm325_vm0, %v439_v18 }
 0x115   : > { %v417_v21 = vpop.xlane.xlu1 %416  ;;  %v415_v22 = vpop.xlane.xlu0 %414 }
 0x116   : > { %v443_v23 = vadd.f32 %v417_v21, %v395_v19  ;;  %v442_v24 = vadd.f32 %v415_v22, %v394_v20 }
 0x117   : > { %v667_v27 = vld [vmem:[#allocation3] sm:$0xff]  ;;  %v669_v31 = vld [vmem:[#allocation3 + $0x10] sm:$0xff] }
 0x118   : > { %460 = vst.msk [vmem:[#allocation3 + $0x28] sm:$0xff] %vm325_vm0, %v443_v23  ;;  %459 = vst.msk [vmem:[#allocation3 + $0x20] sm:$0xff] %vm325_vm0, %v442_v24  ;;  %v683_v28 = vadd.f32 1.0, %v667_v27  ;;  %v685_v38 = vadd.f32 1.0, %v669_v31 }
 0x119   : > { %v421_v29 = vpop.xlane.xlu1 %420  ;;  %v419_v30 = vpop.xlane.xlu0 %418 }
 0x11a   : > { %v445_v32 = vadd.f32 %v421_v29, %v397_v25  ;;  %v444_v33 = vadd.f32 %v419_v30, %v396_v26  ;;  %1545 = vrcp.f32 %v683_v28 }
 0x11b   : > { %v668_v35 = vld [vmem:[#allocation3 + $0x8] sm:$0xff]  ;;  %v670_v41 = vld [vmem:[#allocation3 + $0x18] sm:$0xff] }
 0x11c   : > { %462 = vst.msk [vmem:[#allocation3 + $0x38] sm:$0xff] %vm325_vm0, %v445_v32  ;;  %461 = vst.msk [vmem:[#allocation3 + $0x30] sm:$0xff] %vm325_vm0, %v444_v33  ;;  %v684_v37 = vadd.f32 1.0, %v668_v35  ;;  %v686_v46 = vadd.f32 1.0, %v670_v41 }
 0x11d   : > { %v425_v39 = vpop.xlane.xlu1 %424  ;;  %v423_v40 = vpop.xlane.xlu0 %422 }
 0x11e   : > { %v447_v42 = vadd.f32 %v425_v39, %v399_v34  ;;  %1547 = vrcp.f32 %v684_v37  ;;  %v446_v43 = vadd.f32 %v423_v40, %v398_v36 }
 0x11f   : > { %1549 = vrcp.f32 %v685_v38  ;;  %v671_v49 = vld [vmem:[#allocation3 + $0x20] sm:$0xff]  ;;  %v672_v60 = vld [vmem:[#allocation3 + $0x28] sm:$0xff] }
 0x120   : > { %464 = vst.msk [vmem:[#allocation3 + $0x48] sm:$0xff] %vm325_vm0, %v447_v42  ;;  %463 = vst.msk [vmem:[#allocation3 + $0x40] sm:$0xff] %vm325_vm0, %v446_v43  ;;  %1551 = vrcp.f32 %v686_v46  ;;  %v687_v55 = vadd.f32 1.0, %v671_v49  ;;  %v688_v5 = vadd.f32 1.0, %v672_v60 }
 0x121   : > { %v429_v47 = vpop.xlane.xlu1 %428  ;;  %v427_v48 = vpop.xlane.xlu0 %426 }
 0x122   : > { %v449_v50 = vadd.f32 %v429_v47, %v401_v44  ;;  %v448_v51 = vadd.f32 %v427_v48, %v400_v45  ;;  %1553 = vrcp.f32 %v687_v55 }
 0x123   : > { %v673_v8 = vld [vmem:[#allocation3 + $0x30] sm:$0xff]  ;;  %v674_v15 = vld [vmem:[#allocation3 + $0x38] sm:$0xff] }
 0x124   : > { %v1546_v54 = vpop.eup %1545  ;;  %466 = vst.msk [vmem:[#allocation3 + $0x58] sm:$0xff] %vm325_vm0, %v449_v50  ;;  %465 = vst.msk [vmem:[#allocation3 + $0x50] sm:$0xff] %vm325_vm0, %v448_v51  ;;  %v689_v14 = vadd.f32 1.0, %v673_v8  ;;  %v690_v19 = vadd.f32 1.0, %v674_v15 }
 0x125   : > { %v433_v58 = vpop.xlane.xlu1 %432  ;;  %733 = vperm.xlu0 %1543, %v1546_v54   ;;  %v431_v59 = vpop.xlane.xlu0 %430 }
 0x126   : > { %v451_v62 = vadd.f32 %v433_v58, %v403_v52  ;;  %v450_v63 = vadd.f32 %v431_v59, %v402_v53 }
 0x127   : > { %v676_v1 = vld [vmem:[#allocation3 + $0x48] sm:$0xff]  ;;  %v675_v20 = vld [vmem:[#allocation3 + $0x40] sm:$0xff] }
 0x128   : > { %v1548_v3 = vpop.eup %1547  ;;  %468 = vst.msk [vmem:[#allocation3 + $0x68] sm:$0xff] %vm325_vm0, %v451_v62  ;;  %467 = vst.msk [vmem:[#allocation3 + $0x60] sm:$0xff] %vm325_vm0, %v450_v63  ;;  %v692_v4 = vadd.f32 1.0, %v676_v1  ;;  %v691_v25 = vadd.f32 1.0, %v675_v20 }
 0x129   : > { %v437_v6 = vpop.xlane.xlu1 %436  ;;  %738 = vperm.xlu1 %1544, %v1548_v3   ;;  %v435_v7 = vpop.xlane.xlu0 %434 }
 0x12a   : > { %v1550_v9 = vpop.eup %1549  ;;  %v453_v10 = vadd.f32 %v437_v6, %v405_v0  ;;  %1555 = vrcp.f32 %v692_v4  ;;  %v452_v11 = vadd.f32 %v435_v7, %v404_v2 }
 0x12b   : > { %v678_v12 = vld [vmem:[#allocation3 + $0x58] sm:$0xff]  ;;  %1557 = vrcp.f32 %v688_v5  ;;  %v1552_v16 = vpop.eup %1551  ;;  %v677_v26 = vld [vmem:[#allocation3 + $0x50] sm:$0xff] }
 0x12c   : > { %470 = vst.msk [vmem:[#allocation3 + $0x78] sm:$0xff] %vm325_vm0, %v453_v10  ;;  %469 = vst.msk [vmem:[#allocation3 + $0x70] sm:$0xff] %vm325_vm0, %v452_v11  ;;  %v694_v13 = vadd.f32 1.0, %v678_v12  ;;  %v1554_v21 = vpop.eup %1553  ;;  %v693_v29 = vadd.f32 1.0, %v677_v26  ;;  %v1169_v26 = vld [vmem:[%s2187_s3] ss:$0 sm:$0xff] }
 0x12d   : > { %743 = vperm.xlu1 %1544, %v1550_v9  }
 0x12e   : > { %1559 = vrcp.f32 %v694_v13 }
 0x12f   : > { %v680_v17 = vld [vmem:[#allocation3 + $0x68] sm:$0xff]  ;;  %1561 = vrcp.f32 %v689_v14  ;;  %v679_v30 = vld [vmem:[#allocation3 + $0x60] sm:$0xff] }
 0x130   : > { %v696_v18 = vadd.f32 1.0, %v680_v17  ;;  %v695_v33 = vadd.f32 1.0, %v679_v30 }
 0x131   : > { %748 = vperm.xlu1 %1544, %v1552_v16  }
 0x132   : > { %1563 = vrcp.f32 %v696_v18 }
 0x133   : > { %v682_v22 = vld [vmem:[#allocation3 + $0x78] sm:$0xff]  ;;  %1565 = vrcp.f32 %v690_v19  ;;  %v681_v34 = vld [vmem:[#allocation3 + $0x70] sm:$0xff] }
 0x134   : > { %v1556_v23 = vpop.eup %1555  ;;  %v698_v24 = vadd.f32 1.0, %v682_v22  ;;  %v697_v37 = vadd.f32 1.0, %v681_v34 }
 0x135   : > { %753 = vperm.xlu1 %1544, %v1554_v21   ;;  %778 = vperm.xlu0 %1543, %v1556_v23   ;;  %v1558_v27 = vpop.eup %1557 }
 0x136   : > { %1567 = vrcp.f32 %v698_v24 }
 0x137   : > { %1569 = vrcp.f32 %v691_v25 }
 0x138   : > { %v1560_v28 = vpop.eup %1559  ;;  %1571 = vrcp.f32 %v693_v29 }
 0x139   : > { %758 = vperm.xlu1 %1544, %v1558_v27   ;;  %788 = vperm.xlu0 %1543, %v1560_v28   ;;  %v1562_v31 = vpop.eup %1561  ;;  %1573 = vrcp.f32 %v695_v33 }
 0x13a   : > { %1575 = vrcp.f32 %v697_v37 }
 0x13c   : > { %v1564_v32 = vpop.eup %1563 }
 0x13d   : > { %763 = vperm.xlu1 %1544, %v1562_v31   ;;  %798 = vperm.xlu0 %1543, %v1564_v32   ;;  %v1566_v35 = vpop.eup %1565 }
 0x140   : > { %v1568_v36 = vpop.eup %1567 }
 0x141   : > { %768 = vperm.xlu1 %1544, %v1566_v35   ;;  %808 = vperm.xlu0 %1543, %v1568_v36   ;;  %v1570_v38 = vpop.eup %1569 }
 0x142   : > { %v1572_v39 = vpop.eup %1571 }
 0x143   : > { %v1574_v40 = vpop.eup %1573 }
 0x144   : > { %v1576_v41 = vpop.eup %1575 }
 0x145   : > { %773 = vperm.xlu1 %1544, %v1570_v38  }
 0x149   : > { %783 = vperm.xlu1 %1544, %v1572_v39  }
 0x14d   : > { %793 = vperm.xlu1 %1544, %v1574_v40  }
 0x151   : > { %803 = vperm.xlu1 %1544, %v1576_v41  }
 0x174   : > { %v1315_v42 = vpop.f32.mrb[0].mxu0 }
 0x175   : > { %v553_v43 = vpop.f32.mrb[1].mxu0 }
 0x178   : > { %v1318_v44 = vpop.f32.mrb[2].mxu0 }
 0x179   : > { %v563_v45 = vpop.f32.mrb[3].mxu0 }
 0x17c   : > { %v1321_v46 = vpop.f32.mrb[4].mxu0 }
 0x17d   : > { %v573_v47 = vpop.f32.mrb[5].mxu0 }
 0x180   : > { %v1324_v48 = vpop.f32.mrb[6].mxu0 }
 0x181   : > { %v583_v49 = vpop.f32.mrb[7].mxu0 }
 0x184   : > { %v1327_v50 = vpop.f32.mrb[8].mxu0 }
 0x185   : > { %v593_v51 = vpop.f32.mrb[9].mxu0 }
 0x188   : > { %v1330_v52 = vpop.f32.mrb[10].mxu0 }
 0x189   : > { %v603_v53 = vpop.f32.mrb[11].mxu0 }
 0x18c   : > { %v1333_v54 = vpop.f32.mrb[12].mxu0 }
 0x18d   : > { %v613_v55 = vpop.f32.mrb[13].mxu0 }
 0x190   : > { %v1336_v56 = vpop.f32.mrb[14].mxu0 }
 0x191   : > { %v623_v57 = vpop.f32.mrb[15].mxu0 }
 0x1a4   : > { %v734_v58 = vpop.permute.xlu0 %733 }
 0x1a5   : > { %v811_v59 = vmul.f32 %v734_v58, %v553_v43 }
 0x1a7   : > { %1369 = vmatprep.mubr.f32.mxu1 %v811_v59 }
 0x1a8   : > { %v739_v60 = vpop.permute.xlu1 %738 }
 0x1a9   : > { %v812_v61 = vmul.f32 %v1315_v42, %v739_v60 }
 0x1ab   : > { %1370 = vmatmul.mubr.f32.vlgmr.msra.gmra.mrb[0].mxu1 %v812_v61 }
 0x1ac   : > { %v744_v62 = vpop.permute.xlu1 %743 }
 0x1ad   : > { %v813_v63 = vmul.f32 %v744_v62, %v563_v45 }
 0x1af   : > { %1372 = vmatprep.mubr.f32.mxu1 %v813_v63 }
 0x1b0   : > { %v749_v0 = vpop.permute.xlu1 %748 }
 0x1b1   : > { %v814_v1 = vmul.f32 %v1318_v44, %v749_v0 }
 0x1b3   : > { %1373 = vmatmul.mubr.f32.gmra.mrb[2].mxu1 %v814_v1 }
 0x1b4   : > { %v754_v2 = vpop.permute.xlu1 %753  ;;  %v779_v7 = vpop.permute.xlu0 %778 }
 0x1b5   : > { %v815_v3 = vmul.f32 %v754_v2, %v573_v47  ;;  %v820_v14 = vmul.f32 %v1327_v50, %v779_v7 }
 0x1b7   : > { %1375 = vmatprep.mubr.f32.mxu1 %v815_v3 }
 0x1b8   : > { %v759_v4 = vpop.permute.xlu1 %758  ;;  %v789_v11 = vpop.permute.xlu0 %788 }
 0x1b9   : > { %v816_v5 = vmul.f32 %v1321_v46, %v759_v4  ;;  %v822_v18 = vmul.f32 %v1330_v52, %v789_v11 }
 0x1bb   : > { %1376 = vmatmul.mubr.f32.gmra.mrb[4].mxu1 %v816_v5 }
 0x1bc   : > { %v764_v6 = vpop.permute.xlu1 %763  ;;  %v799_v16 = vpop.permute.xlu0 %798 }
 0x1bd   : > { %v817_v8 = vmul.f32 %v764_v6, %v583_v49  ;;  %v824_v21 = vmul.f32 %v1333_v54, %v799_v16 }
 0x1bf   : > { %1378 = vmatprep.mubr.f32.mxu1 %v817_v8 }
 0x1c0   : > { %v769_v9 = vpop.permute.xlu1 %768  ;;  %v809_v22 = vpop.permute.xlu0 %808 }
 0x1c1   : > { %v818_v10 = vmul.f32 %v1324_v48, %v769_v9  ;;  %v826_v25 = vmul.f32 %v1336_v56, %v809_v22 }
 0x1c3   : > { %1379 = vmatmul.mubr.f32.gmra.mrb[6].mxu1 %v818_v10 }
 0x1c4   : > { %v774_v12 = vpop.permute.xlu1 %773 }
 0x1c5   : > { %v819_v13 = vmul.f32 %v774_v12, %v593_v51 }
 0x1c7   : > { %1381 = vmatprep.mubr.f32.mxu1 %v819_v13 }
 0x1c8   : > { %v784_v15 = vpop.permute.xlu1 %783  ;;  %1382 = vmatmul.mubr.f32.gmra.mrb[8].mxu1 %v820_v14 }
 0x1c9   : > { %v821_v17 = vmul.f32 %v784_v15, %v603_v53 }
 0x1cb   : > { %1384 = vmatprep.mubr.f32.mxu1 %v821_v17 }
 0x1cc   : > { %v794_v19 = vpop.permute.xlu1 %793  ;;  %1385 = vmatmul.mubr.f32.gmra.mrb[10].mxu1 %v822_v18 }
 0x1cd   : > { %v823_v20 = vmul.f32 %v794_v19, %v613_v55 }
 0x1cf   : > { %1387 = vmatprep.mubr.f32.mxu1 %v823_v20 }
 0x1d0   : > { %v804_v23 = vpop.permute.xlu1 %803  ;;  %1388 = vmatmul.mubr.f32.gmra.mrb[12].mxu1 %v824_v21 }
 0x1d1   : > { %v825_v24 = vmul.f32 %v804_v23, %v623_v57 }
 0x1d3   : > { %1390 = vmatprep.mubr.f32.mxu1 %v825_v24 }
 0x1d4   : > { %1391 = vmatmul.mubr.f32.gmra.mrb[14].mxu1 %v826_v25 }
 0x27e   : > { %v1371_v27 = vpop.f32.mrb[0].mxu1 }
 0x27f   : > { %v922_v28 = vadd.f32 %v1371_v27, %v1169_v26  ;;  %v916_v29 = vpop.f32.mrb[1].mxu1 }
 0x280   : > { %v917_v30 = vadd.f32 %v1169_v26, %v916_v29 }
 0x281   : > { %996 = vst [vmem:[%s2110_s10 + $0x8] sm:$0xff] %v922_v28 }
 0x282   : > { %995 = vst [vmem:[%s2110_s10] sm:$0xff] %v917_v30 }
 0x286   : > { %v1374_v31 = vpop.f32.mrb[2].mxu1 }
 0x287   : > { %v932_v32 = vadd.f32 %v1374_v31, %v1169_v26  ;;  %v926_v33 = vpop.f32.mrb[3].mxu1 }
 0x288   : > { %v927_v34 = vadd.f32 %v1169_v26, %v926_v33 }
 0x289   : > { %998 = vst [vmem:[%s2110_s10 + $0x18] sm:$0xff] %v932_v32 }
 0x28a   : > { %997 = vst [vmem:[%s2110_s10 + $0x10] sm:$0xff] %v927_v34 }
 0x28e   : > { %v1377_v35 = vpop.f32.mrb[4].mxu1 }
 0x28f   : > { %v942_v36 = vadd.f32 %v1377_v35, %v1169_v26  ;;  %v936_v37 = vpop.f32.mrb[5].mxu1 }
 0x290   : > { %v937_v38 = vadd.f32 %v1169_v26, %v936_v37 }
 0x291   : > { %1000 = vst [vmem:[%s2110_s10 + $0x28] sm:$0xff] %v942_v36 }
 0x292   : > { %999 = vst [vmem:[%s2110_s10 + $0x20] sm:$0xff] %v937_v38 }
 0x296   : > { %v1380_v39 = vpop.f32.mrb[6].mxu1 }
 0x297   : > { %v952_v40 = vadd.f32 %v1380_v39, %v1169_v26  ;;  %v946_v41 = vpop.f32.mrb[7].mxu1 }
 0x298   : > { %v947_v42 = vadd.f32 %v1169_v26, %v946_v41 }
 0x299   : > { %1002 = vst [vmem:[%s2110_s10 + $0x38] sm:$0xff] %v952_v40 }
 0x29a   : > { %1001 = vst [vmem:[%s2110_s10 + $0x30] sm:$0xff] %v947_v42 }
 0x29b   : > { %v1383_v43 = vpop.f32.mrb[8].mxu1 }
 0x29c   : > { %v962_v44 = vadd.f32 %v1383_v43, %v1169_v26  ;;  %v956_v45 = vpop.f32.mrb[9].mxu1 }
 0x29d   : > { %v957_v46 = vadd.f32 %v1169_v26, %v956_v45 }
 0x29e   : > { %1004 = vst [vmem:[%s2110_s10 + $0x48] sm:$0xff] %v962_v44 }
 0x29f   : > { %1003 = vst [vmem:[%s2110_s10 + $0x40] sm:$0xff] %v957_v46  ;;  %v1386_v47 = vpop.f32.mrb[10].mxu1 }
 0x2a0   : > { %v972_v48 = vadd.f32 %v1386_v47, %v1169_v26  ;;  %v966_v49 = vpop.f32.mrb[11].mxu1 }
 0x2a1   : > { %v967_v50 = vadd.f32 %v1169_v26, %v966_v49 }
 0x2a2   : > { %1006 = vst [vmem:[%s2110_s10 + $0x58] sm:$0xff] %v972_v48 }
 0x2a3   : > { %1005 = vst [vmem:[%s2110_s10 + $0x50] sm:$0xff] %v967_v50  ;;  %v1389_v51 = vpop.f32.mrb[12].mxu1 }
 0x2a4   : > { %v982_v52 = vadd.f32 %v1389_v51, %v1169_v26  ;;  %v976_v53 = vpop.f32.mrb[13].mxu1 }
 0x2a5   : > { %v977_v54 = vadd.f32 %v1169_v26, %v976_v53 }
 0x2a6   : > { %1008 = vst [vmem:[%s2110_s10 + $0x68] sm:$0xff] %v982_v52 }
 0x2a7   : > { %1007 = vst [vmem:[%s2110_s10 + $0x60] sm:$0xff] %v977_v54  ;;  %v1392_v55 = vpop.f32.mrb[14].mxu1 }
 0x2a8   : > { %v992_v56 = vadd.f32 %v1392_v55, %v1169_v26  ;;  %v986_v57 = vpop.f32.mrb[15].mxu1 }
 0x2a9   : > { %v987_v58 = vadd.f32 %v1169_v26, %v986_v57 }
 0x2aa   : > { %1010 = vst [vmem:[%s2110_s10 + $0x78] sm:$0xff] %v992_v56 }
 0x2ab   : > { %1009 = vst [vmem:[%s2110_s10 + $0x70] sm:$0xff] %v987_v58 }
 0x2ac   : > { %1678 = shalt.err (!%p1675_p8)
}
 0x2ad   : > { %s1679_s13 = scalar_lea.hbm %s2131_s26, 2048  ;;  %s1683_s0 = scalar_lea.hbm %s2188_s4, 4096 }
 0x2ae   : > { %p1680_p11 = scmp.ne.s32.totalorder %s2131_s26, %s1679_s13  ;;  %p1684_p6 = scmp.lt.u32.totalorder %s2131_s26, %s2188_s4 }
 0x2af   : > { %p1685_p13 = scmp.lt.u32.totalorder %s1683_s0, %s1679_s13  ;;  %p1687_p5 = scmp.lt.u32.totalorder %s1679_s13, %s2131_s26 }
 0x2b0   : > { %p1681_p12 = pnand %p1680_p11, %p1889_p10 }
 0x2b1   : > { %p1686_p0 = por %p1685_p13, %p1684_p6 }
 0x2b2   : > { %p1682_p3 = pneg %p1681_p12 }
 0x2b3   : > { %p1688_p9 = por %p1687_p5, %p1686_p0 }
 0x2b5   : > { %p1689_p1 = pnand %p1688_p9, %p1682_p3 }
 0x2b7   : > { %1692 = shalt.err (!%p1689_p1)
}
 0x2b8   : > { %s1767_s5 = smov 128   ;;  %s1768_s21 = smov 8  }
 0x2b9   : > { %1465 = dma.vmem_to_hbm [thread:$0]  (%p1889_p10), %s2133_s22, 2048, %s2131_s26, %s1012_s18, %s1767_s5, %s1767_s5, %s1768_s21  }
 0x2ba PF: > { %s1042_s23 = sand.u32 1, %s1735_s15   ;;  %p2216_p2 = scmp.ne.s32.totalorder %s2198_s24, 0 }
 0x2bb   : > { %p2217_p7 = scmp.ge.s32.totalorder %s1755_s20, 2  ;;  %s1043_s10 = scalar_lea.sflag [#allocation6], %s1042_s23 }
 0x2bd   : > { %p1479_p4 = pnand %p2217_p7, %p2216_p2 }
 0x2bf   : > { %1730 = dma.done.wait (!%p1479_p4), %s1043_s10, 2048  }
 0x2c0   : > { %1732 = vsyncadd (!%p1479_p4), %s1043_s10, 4294965248  ;;  %s23_s20 = sadd.s32 1, %s1755_s20   ;;  %s2218_s11 = sld [smem:[#allocation16_spill]] }
 0x2c1   : > { %p20_p8 = scmp.ge.s32.totalorder %s23_s20, 4   ;;  %s2219_s28 = sld [smem:[#allocation15_spill]] }
 0x2c2   : > { %s2220_s15 = smov %s1739_s16  ;;  %s2221_s16 = smov %s1743_s17 }
 0x2c3   : > { %s2223_s18 = smov %s1751_s19  ;;  %22 = sbr.rel (!%p20_p8) target bundleno = 11 (0xb), region = 106 }
 0x2c6   : > { %s2222_s17 = smov %s2218_s11 }
 0x2c7   : > { %s2224_s19 = smov %s2219_s28 }
 0x2ca   :  { %1048 = vsyncpa [#allocation5], 1 }
 0x2cb   :  { %1050 = vsyncpa [#allocation5 + $0x1], 1 }
 0x2cc   :  { %1051 = vsyncpa [#allocation8], 1 }
 0x2cd   :  { %1053 = vsyncpa [#allocation8 + $0x1], 1 }
 0x2ce   :  { %1054 = vsyncpa [#allocation6], 1 }
 0x2cf   :  { %1056 = vsyncpa [#allocation6 + $0x1], 1 }

// kernel: tpu_custom_call.1
= control target key start
LH: loop header
LB: loop body
LE: loop exit
PB: predicated region body
PF: predicated region fallthrough
CT: control target
= control target key end

     0   :  { %s2184_s0 = inlined_call_operand.hbm [shape: bf16[2,128,128], index: 0, kind: input, shape index: {}]   ;;  %s2185_s1 = inlined_call_operand.hbm [shape: f32[2,128,128], index: 1, kind: input, shape index: {}]   ;;  %s2186_s2 = inlined_call_operand.hbm [shape: f32[128,128], index: 2, kind: input, shape index: {}]   ;;  %s2187_s3 = inlined_call_operand.vmem [shape: f32[1,128], index: 3, kind: input, shape index: {}]   ;;  %s2188_s4 = inlined_call_operand.hbm [shape: f32[2,128,128], index: 4, kind: output, shape index: {}]  }
   0x1   :  { %2195 = sst [smem:[#allocation17_spill]] %s2184_s0 }
   0x2   :  { %2196 = sst [smem:[#allocation18_spill]] %s2186_s2 }
   0x3   :  { %9 = vsyncpa [#allocation5], 0 }
   0x4   :  { %11 = vsyncpa [#allocation5 + $0x1], 0 }
   0x5   :  { %12 = vsyncpa [#allocation8], 0 }
   0x6   :  { %14 = vsyncpa [#allocation8 + $0x1], 0 }
   0x7   :  { %15 = vsyncpa [#allocation6], 0 }
   0x8   :  { %17 = vsyncpa [#allocation6 + $0x1], 0  ;;  %s1794_s15 = smov 0   ;;  %s1796_s16 = smov 0  }
   0x9   :  { %s1798_s17 = smov 0   ;;  %s1800_s18 = smov 0  }
   0xa   :  { %s1802_s19 = smov 0   ;;  %s1804_s20 = smov 0  }
   0xb LB: > { %s1825_s21 = sadd.s32 4294967295, %s1755_s20   ;;  %s1154_s22 = sadd.s32 4294967294, %s1755_s20   ;;  %s1755_s20 = sphi %s1804_s20, %s23_s20   ;;  %s1751_s19 = sphi %s1802_s19, %s2224_s19   ;;  %s1747_s18 = sphi %s1800_s18, %s2223_s18   ;;  %s1743_s17 = sphi %s1798_s17, %s2222_s17   ;;  %s1739_s16 = sphi %s1796_s16, %s2221_s16   ;;  %s1735_s15 = sphi %s1794_s15, %s2220_s15  }
   0xc   : > { %p66_p0 = scmp.ne.s32.totalorder %s1739_s16, %s1735_s15  ;;  %p2189_p1 = scmp.eq.s32.totalorder %s1825_s21, 0 }
   0xd   : > { %p168_p3 = scmp.eq.s32.totalorder %s1154_s22, 1  ;;  %p1155_p5 = scmp.ge.s32.totalorder %s1755_s20, 1 }
   0xe   : > { %p1834_p4 = por %p2189_p1, %p66_p0  ;;  %p175_p7 = scmp.lt.s32.totalorder %s1755_s20, 3 }
   0xf   : > { %p1839_p6 = por %p168_p3, %p66_p0  ;;  %s1757_s26 = smov [#allocation9]  }
  0x10   : > { %s2197_s23 = scalar_select %p1834_p4, 1, 0 }
  0x11   : > { %s2198_s24 = scalar_select %p1839_p6, 1, 0 }
  0x12   : > { %p1844_p8 = pnand %p1155_p5, %p175_p7  ;;  %s187_s27 = sshll.u32 %s1757_s26, 4  ;;  %s188_s27 = int_to_ptr.vmem [resolvable:$true] %s187_s27 }
  0x13   : > { %s42_s29 = sadd.s32 1, %s1751_s19  ;;  %s2201_s2 = sld [smem:[#allocation18_spill]] }
  0x14   : > { %s2199_s25 = scalar_select %p1844_p8, 1, 0 }
  0x15   : > { %p1467_p9 = pneg %p1844_p8 }
  0x17   : > { %p1853_p11 = pnand %p1467_p9, %p2189_p1 }
  0x19   : > { %s1577_s6 = scalar_lea.hbm %s2201_s2, 2048  ;;  %p1579_p13 = pneg %p1853_p11 }
  0x1a   : > { %p1578_p12 = scmp.ne.s32.totalorder %s2201_s2, %s1577_s6  ;;  %p1584_p5 = scmp.lt.u32.totalorder %s1577_s6, %s2201_s2 }
  0x1c   : > { %p1580_p0 = pnand %p1579_p13, %p1578_p12 }
  0x1e   : > { %p1581_p3 = pneg %p1580_p0 }
  0x20   : > { %p1586_p7 = pnand %p1584_p5, %p1581_p3 }
  0x22   : > { %1589 = shalt.err (!%p1586_p7)
}
  0x23   : > { %s1590_s11 = scalar_lea.vmem %s188_s27, 2048  ;;  %p1598_p2 = scmp.lt.s32.totalorder %s188_s27, %s188_s27 }
  0x24   : > { %p1591_p9 = scmp.ne.s32.totalorder %s188_s27, %s1590_s11  ;;  %p1599_p6 = scmp.lt.s32.totalorder %s1590_s11, %s1590_s11 }
  0x26   : > { %p1593_p10 = pnand %p1591_p9, %p1579_p13  ;;  %p1600_p4 = por %p1599_p6, %p1598_p2 }
  0x28   : > { %p1594_p1 = pneg %p1593_p10 }
  0x2a   : > { %p1601_p8 = pnand %p1600_p4, %p1594_p1 }
  0x2c   : > { %1604 = shalt.err (!%p1601_p8)
}
  0x2d   : > { %s2192_s12 = smov 128   ;;  %s2193_s13 = smov 8  }
  0x2e   : > { %1470 = dma.hbm_to_vmem [thread:$0]  (!%p1853_p11), %s2201_s2, 2048, %s188_s27, [#allocation8], %s2192_s12, %s2192_s12, %s2193_s13  }
  0x2f   : > { %p44_p1 = scmp.ge.s32.totalorder %s42_s29, 2  ;;  %s53_s26 = sadd.s32 1, %s1743_s17 }
  0x30   : > { %p60_p2 = scmp.ne.s32.totalorder %s1743_s17, %s1739_s16  ;;  %p61_p4 = scmp.eq.s32.totalorder %s1755_s20, 0 }
  0x31   : > { %s2226_s29 = smov (%p44_p1, %s42_s29), 0  ;;  %p2204_p8 = scmp.eq.s32.totalorder %s1825_s21, 1 }
  0x32   : > { %2202 = sst [smem:[#allocation15_spill]] %s2226_s29  ;;  %p1883_p6 = por %p61_p4, %p60_p2 }
  0x33   : > { %p1889_p10 = por %p2204_p8, %p60_p2  ;;  %s46_s5 = ssub.s32 %s1751_s19, %s2226_s29 }
  0x34   : > { %p1483_p11 = scmp.lt.s32.totalorder %s1755_s20, 2  ;;  %p51_p12 = scmp.eq.s32.totalorder %s46_s5, 0 }
  0x35   : > { %s1897_s27 = sand.u32 1, %s1743_s17   ;;  %s1175_s8 = sshll.u32 %s1751_s19, 10 }
  0x36   : > { %s1158_s6 = sshll.u32 %s1897_s27, 6  ;;  %s2207_s0 = sld [smem:[#allocation17_spill]] }
  0x37   : > { %s1901_s7 = scalar_select %p51_p12, %s1743_s17, %s53_s26  }
  0x38   : > { %s208_s14 = scalar_lea.vmem [#allocation4], %s1158_s6  ;;  %p1913_p13 = pnand %p1483_p11, %p1883_p6 }
  0x39   : > { %2206 = sst [smem:[#allocation16_spill]] %s1901_s7  ;;  %s218_s22 = sshll.u32 %s208_s14, 4  ;;  %s1909_s22 = int_to_ptr.vmem [resolvable:$true] %s218_s22 }
  0x3a   : > { %s205_s12 = scalar_lea.sflag [#allocation5], %s1897_s27  ;;  %p1607_p3 = pneg %p1913_p13 }
  0x3c   : > { %s1907_s11 = scalar_lea.hbm %s2207_s0, %s1175_s8  ;;  %s1610_s30 = scalar_lea.hbm %s2207_s0, 2048 }
  0x3d   : > { %s1605_s9 = scalar_lea.hbm %s1907_s11, 1024  ;;  %p1611_p9 = scmp.lt.u32.totalorder %s1907_s11, %s2207_s0 }
  0x3e   : > { %p1606_p0 = scmp.ne.s32.totalorder %s1907_s11, %s1605_s9  ;;  %p1612_p1 = scmp.lt.u32.totalorder %s1610_s30, %s1605_s9 }
  0x3f   : > { %p1614_p4 = scmp.lt.u32.totalorder %s1605_s9, %s1907_s11 }
  0x40   : > { %p1608_p5 = pnand %p1607_p3, %p1606_p0  ;;  %p1613_p2 = por %p1612_p1, %p1611_p9 }
  0x42   : > { %p1609_p7 = pneg %p1608_p5  ;;  %p1615_p6 = por %p1614_p4, %p1613_p2 }
  0x44   : > { %p1616_p8 = pnand %p1615_p6, %p1609_p7 }
  0x46   : > { %1619 = shalt.err (!%p1616_p8)
}
  0x47   : > { %s1620_s13 = scalar_lea.vmem %s1909_s22, 1024  ;;  %s1760_s6 = smov [#allocation4]  }
  0x48   : > { %p1621_p11 = scmp.ne.s32.totalorder %s1909_s22, %s1620_s13  ;;  %s1625_s8 = sshll.u32 %s1760_s6, 4  ;;  %s1626_s8 = int_to_ptr.vmem [resolvable:$false] %s1625_s8 }
  0x49   : > { %s1627_s10 = scalar_lea.vmem %s1626_s8, 2048  ;;  %p1628_p5 = scmp.lt.s32.totalorder %s1909_s22, %s1626_s8 }
  0x4a   : > { %p1623_p12 = pnand %p1621_p11, %p1607_p3  ;;  %p1629_p9 = scmp.lt.s32.totalorder %s1627_s10, %s1620_s13 }
  0x4c   : > { %p1624_p0 = pneg %p1623_p12  ;;  %p1630_p1 = por %p1629_p9, %p1628_p5 }
  0x4e   : > { %p1631_p2 = pnand %p1630_p1, %p1624_p0 }
  0x50   : > { %1634 = shalt.err (!%p1631_p2)
}
  0x51   : > { %s1761_s9 = smov 64   ;;  %s1762_s30 = smov 4  }
  0x52   : > { %1474 = dma.hbm_to_vmem [thread:$0]  (!%p1913_p13), %s1907_s11, 1024, %s1909_s22, %s205_s12, %s1761_s9, %s1761_s9, %s1762_s30  }
  0x53   : > { %s1161_s14 = sshll.u32 %s1897_s27, 7  ;;  %s1176_s6 = sshll.u32 %s1751_s19, 11 }
  0x54   : > { %s1951_s10 = scalar_lea.hbm %s2185_s1, %s1176_s6  ;;  %s232_s26 = scalar_lea.vmem [#allocation7], %s1161_s14 }
  0x55   : > { %s241_s0 = sshll.u32 %s232_s26, 4  ;;  %s2209_s2 = sand.u32 1, %s1755_s20   ;;  %s1953_s0 = int_to_ptr.vmem [resolvable:$true] %s241_s0 }
  0x56   : > { %s1957_s29 = scalar_lea.sflag [#allocation8], %s2209_s2  ;;  %s1635_s7 = scalar_lea.hbm %s1951_s10, 2048 }
  0x57   : > { %p1636_p7 = scmp.ne.s32.totalorder %s1951_s10, %s1635_s7  ;;  %s1640_s11 = scalar_lea.hbm %s2185_s1, 4096 }
  0x58   : > { %p1641_p8 = scmp.lt.u32.totalorder %s1951_s10, %s2185_s1  ;;  %p1642_p11 = scmp.lt.u32.totalorder %s1640_s11, %s1635_s7 }
  0x59   : > { %p1638_p4 = pnand %p1636_p7, %p1607_p3  ;;  %p1644_p0 = scmp.lt.u32.totalorder %s1635_s7, %s1951_s10 }
  0x5a   : > { %p1643_p12 = por %p1642_p11, %p1641_p8 }
  0x5b   : > { %p1639_p6 = pneg %p1638_p4 }
  0x5c   : > { %p1645_p5 = por %p1644_p0, %p1643_p12 }
  0x5e   : > { %p1646_p9 = pnand %p1645_p5, %p1639_p6 }
  0x60   : > { %1649 = shalt.err (!%p1646_p9)
}
  0x61   : > { %s1650_s2 = scalar_lea.vmem %s1953_s0, 2048  ;;  %s1763_s26 = smov [#allocation7]  }
  0x62   : > { %p1651_p1 = scmp.ne.s32.totalorder %s1953_s0, %s1650_s2  ;;  %s1655_s30 = sshll.u32 %s1763_s26, 4  ;;  %s1656_s30 = int_to_ptr.vmem [resolvable:$false] %s1655_s30 }
  0x63   : > { %s1657_s14 = scalar_lea.vmem %s1656_s30, 4096  ;;  %p1658_p4 = scmp.lt.s32.totalorder %s1953_s0, %s1656_s30 }
  0x64   : > { %p1653_p2 = pnand %p1651_p1, %p1607_p3  ;;  %p1659_p8 = scmp.lt.s32.totalorder %s1657_s14, %s1650_s2 }
  0x66   : > { %p1654_p7 = pneg %p1653_p2  ;;  %p1660_p11 = por %p1659_p8, %p1658_p4 }
  0x68   : > { %p1661_p12 = pnand %p1660_p11, %p1654_p7 }
  0x6a   : > { %1664 = shalt.err (!%p1661_p12)
}
  0x6b   : > { %s2210_s7 = smov 8   ;;  %s2211_s6 = smov 128  }
  0x6c   : > { %1477 = dma.hbm_to_vmem [thread:$0]  (!%p1913_p13), %s1951_s10, 2048, %s1953_s0, %s1957_s29, %s2211_s6, %s2211_s6, %s2210_s7  }
  0x6d   : > { %p2212_p3 = scmp.ne.s32.totalorder %s2199_s25, 0 }
  0x6e   : > { %s1989_s8 = sand.u32 (!%p2212_p3), 1, %s1739_s16   ;;  %p2213_p6 = scmp.ne.s32.totalorder (!%p2212_p3), %s2197_s23, 0 }
  0x6f   : > { %253 = sbr.rel (%p2212_p3) target bundleno = 698 (0x2ba), region = 36  ;;  %s1165_s13 = sshll.u32 (!%p2212_p3), %s1989_s8, 6 }
  0x70   : > { %s256_s12 = scalar_lea.sflag (!%p2212_p3), [#allocation5], %s1989_s8  ;;  %s1993_s27 = scalar_lea.vmem (!%p2212_p3), [#allocation4], %s1165_s13 }
  0x76   : > { %1718 = dma.done.wait (%p2213_p6), %s256_s12, 1024  }
  0x77   : > { %1720 = vsyncadd (%p2213_p6), %s256_s12, 4294966272  ;;  %s264_s0 = sand.u32 1, %s1825_s21   ;;  %s1166_s25 = sshll.u32 %s1989_s8, 7 }
  0x78   : > { %s265_s29 = scalar_lea.sflag [#allocation8], %s264_s0  ;;  %s2003_s5 = scalar_lea.vmem [#allocation7], %s1166_s25 }
  0x79   : > { %1722 = dma.done.wait (%p2213_p6), %s265_s29, 2048  }
  0x7a   : > { %1724 = vsyncadd (%p2213_p6), %s265_s29, 4294965248  ;;  %p2214_p13 = scmp.eq.s32.totalorder %s1825_s21, 0 }
  0x7c   : > { %1726 = dma.done.wait (%p2214_p13), [#allocation8], 2048   ;;  %p2215_p0 = pmov %p2214_p13 }
  0x7d   : > { %vm325_vm0 = vcmask 7168   ;;  %v1764_v0 = vmov 0.0   ;;  %v2030_v1 = vld [vmem:[%s1993_s27 + $0x8] sm:$0xff]   ;;  %v2033_v2 = vld [vmem:[%s1993_s27] sm:$0xff]   ;;  %v360_v9 = vld [vmem:[%s2003_s5 + $0x10] sm:$0xff]  ;;  %v1765_v49 = vmov 0  }
  0x7e   : > { %1728 = vsyncadd (%p2215_p0), [#allocation8], 4294965248  ;;  %328 = vst.msk [vmem:[#allocation3 + $0x10] sm:$0xff] %vm325_vm0, %v1764_v0  ;;  %v1184_v3 = vunpack.c.l.bf16 %v2030_v1  ;;  %v1180_v4 = vunpack.c.l.bf16 %v2033_v2  ;;  %v358_v5 = vld [vmem:[%s2003_s5] sm:$0xff]  ;;  %v1185_v6 = vunpack.c.h.bf16 %v2030_v1  ;;  %v1181_v7 = vunpack.c.h.bf16 %v2033_v2  ;;  %v359_v8 = vld [vmem:[%s2003_s5 + $0x8] sm:$0xff]  ;;  %1543 = vset.pattern.permute.xlu0 %v1765_v49  ;;  %1544 = vset.pattern.permute.xlu1 %v1765_v49  ;;  %s2110_s10 = scalar_lea.vmem [#allocation10], %s1166_s25 }
  0x7f   : > { %326 = vst.msk [vmem:[#allocation3] sm:$0xff] %vm325_vm0, %v1764_v0  ;;  %327 = vst.msk [vmem:[#allocation3 + $0x8] sm:$0xff] %vm325_vm0, %v1764_v0  ;;  %v361_v10 = vld [vmem:[%s2003_s5 + $0x18] sm:$0xff]  ;;  %v2046_v11 = vld [vmem:[%s1993_s27 + $0x10] sm:$0xff]   ;;  %v1393_v12 = vpack.c.bf16 %v359_v8, %v358_v5  ;;  %s1177_s11 = sshll.u32 %s1747_s18, 11  ;;  %s1027_s22 = sshll.u32 %s2110_s10, 4  ;;  %s2133_s22 = int_to_ptr.vmem [resolvable:$true] %s1027_s22 }
  0x80   : > { %329 = vst.msk [vmem:[#allocation3 + $0x18] sm:$0xff] %vm325_vm0, %v1764_v0  ;;  %330 = vst.msk [vmem:[#allocation3 + $0x20] sm:$0xff] %vm325_vm0, %v1764_v0  ;;  %410 = vadd.xlane.f32.xlu1 %v1184_v3  ;;  %406 = vadd.xlane.f32.xlu0 %v1180_v4  ;;  %v1397_v13 = vpack.c.bf16 %v361_v10, %v360_v9  ;;  %v1189_v14 = vunpack.c.h.bf16 %v2046_v11  ;;  %v1188_v15 = vunpack.c.l.bf16 %v2046_v11  ;;  %v362_v16 = vld [vmem:[%s2003_s5 + $0x20] sm:$0xff]  ;;  %v363_v17 = vld [vmem:[%s2003_s5 + $0x28] sm:$0xff]  ;;  %s2131_s26 = scalar_lea.hbm %s2188_s4, %s1177_s11  ;;  %s1012_s18 = scalar_lea.sflag [#allocation6], %s1989_s8 }
  0x81   : > { %331 = vst.msk [vmem:[#allocation3 + $0x28] sm:$0xff] %vm325_vm0, %v1764_v0  ;;  %332 = vst.msk [vmem:[#allocation3 + $0x30] sm:$0xff] %vm325_vm0, %v1764_v0  ;;  %1313 = vmatprep.mubr.f32.mxu0 %v1180_v4  ;;  %v2057_v18 = vld [vmem:[%s1993_s27 + $0x18] sm:$0xff]   ;;  %1394 = vmatprep.subr.bf16.mxu0 %v1393_v12  ;;  %v1401_v19 = vpack.c.bf16 %v363_v17, %v362_v16  ;;  %v364_v22 = vld [vmem:[%s2003_s5 + $0x30] sm:$0xff]  ;;  %s1665_s30 = scalar_lea.vmem %s2133_s22, 2048  ;;  %s1766_s14 = smov [#allocation10]  }
  0x82   : > { %333 = vst.msk [vmem:[#allocation3 + $0x38] sm:$0xff] %vm325_vm0, %v1764_v0  ;;  %334 = vst.msk [vmem:[#allocation3 + $0x40] sm:$0xff] %vm325_vm0, %v1764_v0  ;;  %1396 = vmatpush3.bf16.msra.mxu0 %v1393_v12  ;;  %v1193_v20 = vunpack.c.h.bf16 %v2057_v18  ;;  %v1192_v21 = vunpack.c.l.bf16 %v2057_v18  ;;  %v365_v23 = vld [vmem:[%s2003_s5 + $0x38] sm:$0xff]  ;;  %v1213_v24 = vld [vmem:[%s1993_s27 + $0x20] sm:$0xff]   ;;  %p1666_p5 = scmp.ne.s32.totalorder %s2133_s22, %s1665_s30  ;;  %s1669_s7 = sshll.u32 %s1766_s14, 4  ;;  %s1670_s7 = int_to_ptr.vmem [resolvable:$false] %s1669_s7 }
  0x83   : > { %335 = vst.msk [vmem:[#allocation3 + $0x48] sm:$0xff] %vm325_vm0, %v1764_v0  ;;  %336 = vst.msk [vmem:[#allocation3 + $0x50] sm:$0xff] %vm325_vm0, %v1764_v0  ;;  %1398 = vmatprep.subr.bf16.mxu0 %v1397_v13  ;;  %v1405_v25 = vpack.c.bf16 %v365_v23, %v364_v22  ;;  %v1197_v26 = vunpack.c.h.bf16 %v1213_v24  ;;  %v1196_v27 = vunpack.c.l.bf16 %v1213_v24  ;;  %v366_v28 = vld [vmem:[%s2003_s5 + $0x40] sm:$0xff]  ;;  %v367_v29 = vld [vmem:[%s2003_s5 + $0x48] sm:$0xff]  ;;  %s1671_s6 = scalar_lea.vmem %s1670_s7, 4096  ;;  %p1672_p2 = scmp.lt.s32.totalorder %s2133_s22, %s1670_s7 }
  0x84   : > { %337 = vst.msk [vmem:[#allocation3 + $0x58] sm:$0xff] %vm325_vm0, %v1764_v0  ;;  %338 = vst.msk [vmem:[#allocation3 + $0x60] sm:$0xff] %vm325_vm0, %v1764_v0  ;;  %412 = vadd.xlane.f32.xlu1 %v1185_v6  ;;  %408 = vadd.xlane.f32.xlu0 %v1181_v7  ;;  %v1214_v30 = vld [vmem:[%s1993_s27 + $0x28] sm:$0xff]   ;;  %v1409_v31 = vpack.c.bf16 %v367_v29, %v366_v28  ;;  %v368_v34 = vld [vmem:[%s2003_s5 + $0x50] sm:$0xff]  ;;  %p1667_p9 = pnand %p1666_p5, %p1889_p10  ;;  %p1673_p7 = scmp.lt.s32.totalorder %s1671_s6, %s1665_s30 }
  0x85   : > { %339 = vst.msk [vmem:[#allocation3 + $0x68] sm:$0xff] %vm325_vm0, %v1764_v0  ;;  %340 = vst.msk [vmem:[#allocation3 + $0x70] sm:$0xff] %vm325_vm0, %v1764_v0  ;;  %v1201_v32 = vunpack.c.h.bf16 %v1214_v30  ;;  %v1200_v33 = vunpack.c.l.bf16 %v1214_v30  ;;  %v369_v35 = vld [vmem:[%s2003_s5 + $0x58] sm:$0xff]  ;;  %v1215_v36 = vld [vmem:[%s1993_s27 + $0x30] sm:$0xff]  }
  0x86   : > { %341 = vst.msk [vmem:[#allocation3 + $0x78] sm:$0xff] %vm325_vm0, %v1764_v0  ;;  %1400 = vmatpush3.bf16.msra.mxu0 %v1397_v13  ;;  %v1413_v37 = vpack.c.bf16 %v369_v35, %v368_v34  ;;  %v1205_v38 = vunpack.c.h.bf16 %v1215_v36  ;;  %v1204_v39 = vunpack.c.l.bf16 %v1215_v36  ;;  %v370_v40 = vld [vmem:[%s2003_s5 + $0x60] sm:$0xff]  ;;  %v371_v41 = vld [vmem:[%s2003_s5 + $0x68] sm:$0xff]  ;;  %v1216_v42 = vld [vmem:[%s1993_s27 + $0x38] sm:$0xff]   ;;  %p1668_p1 = pneg %p1667_p9  ;;  %p1674_p4 = por %p1673_p7, %p1672_p2 }
  0x87   : > { %1402 = vmatprep.subr.bf16.mxu0 %v1401_v19  ;;  %v1417_v43 = vpack.c.bf16 %v371_v41, %v370_v40  ;;  %v1209_v44 = vunpack.c.h.bf16 %v1216_v42  ;;  %v1208_v45 = vunpack.c.l.bf16 %v1216_v42  ;;  %v372_v46 = vld [vmem:[%s2003_s5 + $0x70] sm:$0xff]  ;;  %v373_v47 = vld [vmem:[%s2003_s5 + $0x78] sm:$0xff]  ;;  %v827_v50 = vld [vmem:[#allocation9] sm:$0xff] }
  0x88   : > { %416 = vadd.xlane.f32.xlu1 %v1189_v14  ;;  %414 = vadd.xlane.f32.xlu0 %v1188_v15  ;;  %v1421_v48 = vpack.c.bf16 %v373_v47, %v372_v46  ;;  %v828_v51 = vld [vmem:[#allocation9 + $0x8] sm:$0xff]  ;;  %v829_v52 = vld [vmem:[#allocation9 + $0x10] sm:$0xff]  ;;  %v830_v54 = vld [vmem:[#allocation9 + $0x18] sm:$0xff]  ;;  %p1675_p8 = pnand %p1674_p4, %p1668_p1 }
  0x89   : > { %v1425_v53 = vpack.c.bf16 %v828_v51, %v827_v50  ;;  %v1429_v55 = vpack.c.bf16 %v830_v54, %v829_v52  ;;  %v831_v56 = vld [vmem:[#allocation9 + $0x20] sm:$0xff]  ;;  %v832_v57 = vld [vmem:[#allocation9 + $0x28] sm:$0xff]  ;;  %v833_v59 = vld [vmem:[#allocation9 + $0x30] sm:$0xff] }
  0x8a   : > { %1404 = vmatpush3.bf16.msra.mxu0 %v1401_v19  ;;  %v1433_v58 = vpack.c.bf16 %v832_v57, %v831_v56  ;;  %v834_v60 = vld [vmem:[#allocation9 + $0x38] sm:$0xff]  ;;  %v835_v62 = vld [vmem:[#allocation9 + $0x40] sm:$0xff]  ;;  %v836_v63 = vld [vmem:[#allocation9 + $0x48] sm:$0xff] }
  0x8b   : > { %1406 = vmatprep.subr.bf16.mxu0 %v1405_v25  ;;  %1426 = vmatprep.subr.bf16.mxu1 %v1425_v53  ;;  %v1437_v61 = vpack.c.bf16 %v834_v60, %v833_v59  ;;  %v1441_v0 = vpack.c.bf16 %v836_v63, %v835_v62  ;;  %v837_v1 = vld [vmem:[#allocation9 + $0x50] sm:$0xff]  ;;  %v838_v2 = vld [vmem:[#allocation9 + $0x58] sm:$0xff]  ;;  %v839_v4 = vld [vmem:[#allocation9 + $0x60] sm:$0xff] }
  0x8c   : > { %420 = vadd.xlane.f32.xlu1 %v1193_v20  ;;  %418 = vadd.xlane.f32.xlu0 %v1192_v21  ;;  %v840_v5 = vld [vmem:[#allocation9 + $0x68] sm:$0xff]  ;;  %v390_v8 = vld [vmem:[#allocation3] sm:$0xff]  ;;  %v393_v13 = vld [vmem:[#allocation3 + $0x18] sm:$0xff] }
  0x8d   : > { %1428 = vmatpush3.bf16.msra.mxu1 %v1425_v53  ;;  %v395_v19 = vld [vmem:[#allocation3 + $0x28] sm:$0xff]  ;;  %v398_v36 = vld [vmem:[#allocation3 + $0x40] sm:$0xff]  ;;  %v841_v56 = vld [vmem:[#allocation9 + $0x70] sm:$0xff] }
  0x8e   : > { %1408 = vmatpush3.bf16.msra.mxu0 %v1405_v25  ;;  %1430 = vmatprep.subr.bf16.mxu1 %v1429_v55  ;;  %v397_v25 = vld [vmem:[#allocation3 + $0x38] sm:$0xff]  ;;  %v399_v34 = vld [vmem:[#allocation3 + $0x48] sm:$0xff]  ;;  %v402_v53 = vld [vmem:[#allocation3 + $0x60] sm:$0xff] }
  0x8f   : > { %1410 = vmatprep.subr.bf16.mxu0 %v1409_v31  ;;  %v403_v52 = vld [vmem:[#allocation3 + $0x68] sm:$0xff]  ;;  %v842_v57 = vld [vmem:[#allocation9 + $0x78] sm:$0xff] }
  0x90   : > { %424 = vadd.xlane.f32.xlu1 %v1197_v26  ;;  %422 = vadd.xlane.f32.xlu0 %v1196_v27 }
  0x91   : > { %1432 = vmatpush3.bf16.msra.mxu1 %v1429_v55 }
  0x92   : > { %1412 = vmatpush3.bf16.msra.mxu0 %v1409_v31  ;;  %1434 = vmatprep.subr.bf16.mxu1 %v1433_v58 }
  0x93   : > { %1414 = vmatprep.subr.bf16.mxu0 %v1413_v37 }
  0x94   : > { %428 = vadd.xlane.f32.xlu1 %v1201_v32  ;;  %426 = vadd.xlane.f32.xlu0 %v1200_v33 }
  0x95   : > { %1436 = vmatpush3.bf16.msra.mxu1 %v1433_v58 }
  0x96   : > { %1416 = vmatpush3.bf16.msra.mxu0 %v1413_v37  ;;  %1438 = vmatprep.subr.bf16.mxu1 %v1437_v61 }
  0x97   : > { %1418 = vmatprep.subr.bf16.mxu0 %v1417_v43 }
  0x98   : > { %432 = vadd.xlane.f32.xlu1 %v1205_v38  ;;  %430 = vadd.xlane.f32.xlu0 %v1204_v39 }
  0x99   : > { %1440 = vmatpush3.bf16.msra.mxu1 %v1437_v61  ;;  %v1453_v61 = vpack.c.bf16 %v842_v57, %v841_v56 }
  0x9a   : > { %1420 = vmatpush3.bf16.msra.mxu0 %v1417_v43  ;;  %1442 = vmatprep.subr.bf16.mxu1 %v1441_v0 }
  0x9b   : > { %1422 = vmatprep.subr.bf16.mxu0 %v1421_v48 }
  0x9c   : > { %436 = vadd.xlane.f32.xlu1 %v1209_v44  ;;  %434 = vadd.xlane.f32.xlu0 %v1208_v45 }
  0x9d   : > { %1444 = vmatpush3.bf16.msra.mxu1 %v1441_v0  ;;  %v405_v0 = vld [vmem:[#allocation3 + $0x78] sm:$0xff] }
  0x9e   : > { %1424 = vmatpush3.bf16.msra.mxu0 %v1421_v48 }
  0xa1   : > { %1314 = vmatmul.mubr.f32.vlgmr.msra.gmra.mrb[0].mxu0 %v1181_v7  ;;  %v392_v7 = vld [vmem:[#allocation3 + $0x10] sm:$0xff] }
  0xa2   : > { %1316 = vmatprep.mubr.f32.mxu0 %v1184_v3  ;;  %v1445_v3 = vpack.c.bf16 %v838_v2, %v837_v1  ;;  %v404_v2 = vld [vmem:[#allocation3 + $0x70] sm:$0xff] }
  0xa4   : > { %1446 = vmatprep.subr.bf16.mxu1 %v1445_v3 }
  0xa5   : > { %1317 = vmatmul.mubr.f32.gmra.mrb[2].mxu0 %v1185_v6  ;;  %1448 = vmatpush3.bf16.msra.mxu1 %v1445_v3  ;;  %v1449_v6 = vpack.c.bf16 %v840_v5, %v839_v4 }
  0xa6   : > { %1319 = vmatprep.mubr.f32.mxu0 %v1188_v15 }
  0xa7   : > { %1450 = vmatprep.subr.bf16.mxu1 %v1449_v6 }
  0xa9   : > { %1320 = vmatmul.mubr.f32.gmra.mrb[4].mxu0 %v1189_v14  ;;  %1452 = vmatpush3.bf16.msra.mxu1 %v1449_v6  ;;  %v391_v14 = vld [vmem:[#allocation3 + $0x8] sm:$0xff] }
  0xaa   : > { %1322 = vmatprep.mubr.f32.mxu0 %v1192_v21  ;;  %1454 = vmatprep.subr.bf16.mxu1 %v1453_v61 }
  0xad   : > { %1323 = vmatmul.mubr.f32.gmra.mrb[6].mxu0 %v1193_v20  ;;  %v394_v20 = vld [vmem:[#allocation3 + $0x20] sm:$0xff]  ;;  %1456 = vmatpush3.bf16.msra.mxu1 %v1453_v61 }
  0xae   : > { %1325 = vmatprep.mubr.f32.mxu0 %v1196_v27 }
  0xb1   : > { %1326 = vmatmul.mubr.f32.gmra.mrb[8].mxu0 %v1197_v26  ;;  %v396_v26 = vld [vmem:[#allocation3 + $0x30] sm:$0xff] }
  0xb2   : > { %1328 = vmatprep.mubr.f32.mxu0 %v1200_v33 }
  0xb5   : > { %1329 = vmatmul.mubr.f32.gmra.mrb[10].mxu0 %v1201_v32 }
  0xb6   : > { %1331 = vmatprep.mubr.f32.mxu0 %v1204_v39 }
  0xb9   : > { %1332 = vmatmul.mubr.f32.gmra.mrb[12].mxu0 %v1205_v38 }
  0xba   : > { %1334 = vmatprep.mubr.f32.mxu0 %v1208_v45  ;;  %v400_v45 = vld [vmem:[#allocation3 + $0x50] sm:$0xff] }
  0xbd   : > { %1335 = vmatmul.mubr.f32.gmra.mrb[14].mxu0 %v1209_v44  ;;  %v401_v44 = vld [vmem:[#allocation3 + $0x58] sm:$0xff] }
 0x10d   : > { %v411_v9 = vpop.xlane.xlu1 %410  ;;  %v407_v10 = vpop.xlane.xlu0 %406 }
 0x10e   : > { %v440_v11 = vadd.f32 %v411_v9, %v392_v7  ;;  %v438_v12 = vadd.f32 %v407_v10, %v390_v8 }
 0x110   : > { %457 = vst.msk [vmem:[#allocation3 + $0x10] sm:$0xff] %vm325_vm0, %v440_v11  ;;  %455 = vst.msk [vmem:[#allocation3] sm:$0xff] %vm325_vm0, %v438_v12 }
 0x111   : > { %v413_v15 = vpop.xlane.xlu1 %412  ;;  %v409_v16 = vpop.xlane.xlu0 %408 }
 0x112   : > { %v441_v17 = vadd.f32 %v413_v15, %v393_v13  ;;  %v439_v18 = vadd.f32 %v409_v16, %v391_v14 }
 0x114   : > { %458 = vst.msk [vmem:[#allocation3 + $0x18] sm:$0xff] %vm325_vm0, %v441_v17  ;;  %456 = vst.msk [vmem:[#allocation3 + $0x8] sm:$0xff] %vm325_vm0, %v439_v18 }
 0x115   : > { %v417_v21 = vpop.xlane.xlu1 %416  ;;  %v415_v22 = vpop.xlane.xlu0 %414 }
 0x116   : > { %v443_v23 = vadd.f32 %v417_v21, %v395_v19  ;;  %v442_v24 = vadd.f32 %v415_v22, %v394_v20 }
 0x117   : > { %v667_v27 = vld [vmem:[#allocation3] sm:$0xff]  ;;  %v669_v31 = vld [vmem:[#allocation3 + $0x10] sm:$0xff] }
 0x118   : > { %460 = vst.msk [vmem:[#allocation3 + $0x28] sm:$0xff] %vm325_vm0, %v443_v23  ;;  %459 = vst.msk [vmem:[#allocation3 + $0x20] sm:$0xff] %vm325_vm0, %v442_v24  ;;  %v683_v28 = vadd.f32 1.0, %v667_v27  ;;  %v685_v38 = vadd.f32 1.0, %v669_v31 }
 0x119   : > { %v421_v29 = vpop.xlane.xlu1 %420  ;;  %v419_v30 = vpop.xlane.xlu0 %418 }
 0x11a   : > { %v445_v32 = vadd.f32 %v421_v29, %v397_v25  ;;  %v444_v33 = vadd.f32 %v419_v30, %v396_v26  ;;  %1545 = vrcp.f32 %v683_v28 }
 0x11b   : > { %v668_v35 = vld [vmem:[#allocation3 + $0x8] sm:$0xff]  ;;  %v670_v41 = vld [vmem:[#allocation3 + $0x18] sm:$0xff] }
 0x11c   : > { %462 = vst.msk [vmem:[#allocation3 + $0x38] sm:$0xff] %vm325_vm0, %v445_v32  ;;  %461 = vst.msk [vmem:[#allocation3 + $0x30] sm:$0xff] %vm325_vm0, %v444_v33  ;;  %v684_v37 = vadd.f32 1.0, %v668_v35  ;;  %v686_v46 = vadd.f32 1.0, %v670_v41 }
 0x11d   : > { %v425_v39 = vpop.xlane.xlu1 %424  ;;  %v423_v40 = vpop.xlane.xlu0 %422 }
 0x11e   : > { %v447_v42 = vadd.f32 %v425_v39, %v399_v34  ;;  %1547 = vrcp.f32 %v684_v37  ;;  %v446_v43 = vadd.f32 %v423_v40, %v398_v36 }
 0x11f   : > { %1549 = vrcp.f32 %v685_v38  ;;  %v671_v49 = vld [vmem:[#allocation3 + $0x20] sm:$0xff]  ;;  %v672_v60 = vld [vmem:[#allocation3 + $0x28] sm:$0xff] }
 0x120   : > { %464 = vst.msk [vmem:[#allocation3 + $0x48] sm:$0xff] %vm325_vm0, %v447_v42  ;;  %463 = vst.msk [vmem:[#allocation3 + $0x40] sm:$0xff] %vm325_vm0, %v446_v43  ;;  %1551 = vrcp.f32 %v686_v46  ;;  %v687_v55 = vadd.f32 1.0, %v671_v49  ;;  %v688_v5 = vadd.f32 1.0, %v672_v60 }
 0x121   : > { %v429_v47 = vpop.xlane.xlu1 %428  ;;  %v427_v48 = vpop.xlane.xlu0 %426 }
 0x122   : > { %v449_v50 = vadd.f32 %v429_v47, %v401_v44  ;;  %v448_v51 = vadd.f32 %v427_v48, %v400_v45  ;;  %1553 = vrcp.f32 %v687_v55 }
 0x123   : > { %v673_v8 = vld [vmem:[#allocation3 + $0x30] sm:$0xff]  ;;  %v674_v15 = vld [vmem:[#allocation3 + $0x38] sm:$0xff] }
 0x124   : > { %v1546_v54 = vpop.eup %1545  ;;  %466 = vst.msk [vmem:[#allocation3 + $0x58] sm:$0xff] %vm325_vm0, %v449_v50  ;;  %465 = vst.msk [vmem:[#allocation3 + $0x50] sm:$0xff] %vm325_vm0, %v448_v51  ;;  %v689_v14 = vadd.f32 1.0, %v673_v8  ;;  %v690_v19 = vadd.f32 1.0, %v674_v15 }
 0x125   : > { %v433_v58 = vpop.xlane.xlu1 %432  ;;  %733 = vperm.xlu0 %1543, %v1546_v54   ;;  %v431_v59 = vpop.xlane.xlu0 %430 }
 0x126   : > { %v451_v62 = vadd.f32 %v433_v58, %v403_v52  ;;  %v450_v63 = vadd.f32 %v431_v59, %v402_v53 }
 0x127   : > { %v676_v1 = vld [vmem:[#allocation3 + $0x48] sm:$0xff]  ;;  %v675_v20 = vld [vmem:[#allocation3 + $0x40] sm:$0xff] }
 0x128   : > { %v1548_v3 = vpop.eup %1547  ;;  %468 = vst.msk [vmem:[#allocation3 + $0x68] sm:$0xff] %vm325_vm0, %v451_v62  ;;  %467 = vst.msk [vmem:[#allocation3 + $0x60] sm:$0xff] %vm325_vm0, %v450_v63  ;;  %v692_v4 = vadd.f32 1.0, %v676_v1  ;;  %v691_v25 = vadd.f32 1.0, %v675_v20 }
 0x129   : > { %v437_v6 = vpop.xlane.xlu1 %436  ;;  %738 = vperm.xlu1 %1544, %v1548_v3   ;;  %v435_v7 = vpop.xlane.xlu0 %434 }
 0x12a   : > { %v1550_v9 = vpop.eup %1549  ;;  %v453_v10 = vadd.f32 %v437_v6, %v405_v0  ;;  %1555 = vrcp.f32 %v692_v4  ;;  %v452_v11 = vadd.f32 %v435_v7, %v404_v2 }
 0x12b   : > { %v678_v12 = vld [vmem:[#allocation3 + $0x58] sm:$0xff]  ;;  %1557 = vrcp.f32 %v688_v5  ;;  %v1552_v16 = vpop.eup %1551  ;;  %v677_v26 = vld [vmem:[#allocation3 + $0x50] sm:$0xff] }
 0x12c   : > { %470 = vst.msk [vmem:[#allocation3 + $0x78] sm:$0xff] %vm325_vm0, %v453_v10  ;;  %469 = vst.msk [vmem:[#allocation3 + $0x70] sm:$0xff] %vm325_vm0, %v452_v11  ;;  %v694_v13 = vadd.f32 1.0, %v678_v12  ;;  %v1554_v21 = vpop.eup %1553  ;;  %v693_v29 = vadd.f32 1.0, %v677_v26  ;;  %v1169_v26 = vld [vmem:[%s2187_s3] ss:$0 sm:$0xff] }
 0x12d   : > { %743 = vperm.xlu1 %1544, %v1550_v9  }
 0x12e   : > { %1559 = vrcp.f32 %v694_v13 }
 0x12f   : > { %v680_v17 = vld [vmem:[#allocation3 + $0x68] sm:$0xff]  ;;  %1561 = vrcp.f32 %v689_v14  ;;  %v679_v30 = vld [vmem:[#allocation3 + $0x60] sm:$0xff] }
 0x130   : > { %v696_v18 = vadd.f32 1.0, %v680_v17  ;;  %v695_v33 = vadd.f32 1.0, %v679_v30 }
 0x131   : > { %748 = vperm.xlu1 %1544, %v1552_v16  }
 0x132   : > { %1563 = vrcp.f32 %v696_v18 }
 0x133   : > { %v682_v22 = vld [vmem:[#allocation3 + $0x78] sm:$0xff]  ;;  %1565 = vrcp.f32 %v690_v19  ;;  %v681_v34 = vld [vmem:[#allocation3 + $0x70] sm:$0xff] }
 0x134   : > { %v1556_v23 = vpop.eup %1555  ;;  %v698_v24 = vadd.f32 1.0, %v682_v22  ;;  %v697_v37 = vadd.f32 1.0, %v681_v34 }
 0x135   : > { %753 = vperm.xlu1 %1544, %v1554_v21   ;;  %778 = vperm.xlu0 %1543, %v1556_v23   ;;  %v1558_v27 = vpop.eup %1557 }
 0x136   : > { %1567 = vrcp.f32 %v698_v24 }
 0x137   : > { %1569 = vrcp.f32 %v691_v25 }
 0x138   : > { %v1560_v28 = vpop.eup %1559  ;;  %1571 = vrcp.f32 %v693_v29 }
 0x139   : > { %758 = vperm.xlu1 %1544, %v1558_v27   ;;  %788 = vperm.xlu0 %1543, %v1560_v28   ;;  %v1562_v31 = vpop.eup %1561  ;;  %1573 = vrcp.f32 %v695_v33 }
 0x13a   : > { %1575 = vrcp.f32 %v697_v37 }
 0x13c   : > { %v1564_v32 = vpop.eup %1563 }
 0x13d   : > { %763 = vperm.xlu1 %1544, %v1562_v31   ;;  %798 = vperm.xlu0 %1543, %v1564_v32   ;;  %v1566_v35 = vpop.eup %1565 }
 0x140   : > { %v1568_v36 = vpop.eup %1567 }
 0x141   : > { %768 = vperm.xlu1 %1544, %v1566_v35   ;;  %808 = vperm.xlu0 %1543, %v1568_v36   ;;  %v1570_v38 = vpop.eup %1569 }
 0x142   : > { %v1572_v39 = vpop.eup %1571 }
 0x143   : > { %v1574_v40 = vpop.eup %1573 }
 0x144   : > { %v1576_v41 = vpop.eup %1575 }
 0x145   : > { %773 = vperm.xlu1 %1544, %v1570_v38  }
 0x149   : > { %783 = vperm.xlu1 %1544, %v1572_v39  }
 0x14d   : > { %793 = vperm.xlu1 %1544, %v1574_v40  }
 0x151   : > { %803 = vperm.xlu1 %1544, %v1576_v41  }
 0x174   : > { %v1315_v42 = vpop.f32.mrb[0].mxu0 }
 0x175   : > { %v553_v43 = vpop.f32.mrb[1].mxu0 }
 0x178   : > { %v1318_v44 = vpop.f32.mrb[2].mxu0 }
 0x179   : > { %v563_v45 = vpop.f32.mrb[3].mxu0 }
 0x17c   : > { %v1321_v46 = vpop.f32.mrb[4].mxu0 }
 0x17d   : > { %v573_v47 = vpop.f32.mrb[5].mxu0 }
 0x180   : > { %v1324_v48 = vpop.f32.mrb[6].mxu0 }
 0x181   : > { %v583_v49 = vpop.f32.mrb[7].mxu0 }
 0x184   : > { %v1327_v50 = vpop.f32.mrb[8].mxu0 }
 0x185   : > { %v593_v51 = vpop.f32.mrb[9].mxu0 }
 0x188   : > { %v1330_v52 = vpop.f32.mrb[10].mxu0 }
 0x189   : > { %v603_v53 = vpop.f32.mrb[11].mxu0 }
 0x18c   : > { %v1333_v54 = vpop.f32.mrb[12].mxu0 }
 0x18d   : > { %v613_v55 = vpop.f32.mrb[13].mxu0 }
 0x190   : > { %v1336_v56 = vpop.f32.mrb[14].mxu0 }
 0x191   : > { %v623_v57 = vpop.f32.mrb[15].mxu0 }
 0x1a4   : > { %v734_v58 = vpop.permute.xlu0 %733 }
 0x1a5   : > { %v811_v59 = vmul.f32 %v734_v58, %v553_v43 }
 0x1a7   : > { %1369 = vmatprep.mubr.f32.mxu1 %v811_v59 }
 0x1a8   : > { %v739_v60 = vpop.permute.xlu1 %738 }
 0x1a9   : > { %v812_v61 = vmul.f32 %v1315_v42, %v739_v60 }
 0x1ab   : > { %1370 = vmatmul.mubr.f32.vlgmr.msra.gmra.mrb[0].mxu1 %v812_v61 }
 0x1ac   : > { %v744_v62 = vpop.permute.xlu1 %743 }
 0x1ad   : > { %v813_v63 = vmul.f32 %v744_v62, %v563_v45 }
 0x1af   : > { %1372 = vmatprep.mubr.f32.mxu1 %v813_v63 }
 0x1b0   : > { %v749_v0 = vpop.permute.xlu1 %748 }
 0x1b1   : > { %v814_v1 = vmul.f32 %v1318_v44, %v749_v0 }
 0x1b3   : > { %1373 = vmatmul.mubr.f32.gmra.mrb[2].mxu1 %v814_v1 }
 0x1b4   : > { %v754_v2 = vpop.permute.xlu1 %753  ;;  %v779_v7 = vpop.permute.xlu0 %778 }
 0x1b5   : > { %v815_v3 = vmul.f32 %v754_v2, %v573_v47  ;;  %v820_v14 = vmul.f32 %v1327_v50, %v779_v7 }
 0x1b7   : > { %1375 = vmatprep.mubr.f32.mxu1 %v815_v3 }
 0x1b8   : > { %v759_v4 = vpop.permute.xlu1 %758  ;;  %v789_v11 = vpop.permute.xlu0 %788 }
 0x1b9   : > { %v816_v5 = vmul.f32 %v1321_v46, %v759_v4  ;;  %v822_v18 = vmul.f32 %v1330_v52, %v789_v11 }
 0x1bb   : > { %1376 = vmatmul.mubr.f32.gmra.mrb[4].mxu1 %v816_v5 }
 0x1bc   : > { %v764_v6 = vpop.permute.xlu1 %763  ;;  %v799_v16 = vpop.permute.xlu0 %798 }
 0x1bd   : > { %v817_v8 = vmul.f32 %v764_v6, %v583_v49  ;;  %v824_v21 = vmul.f32 %v1333_v54, %v799_v16 }
 0x1bf   : > { %1378 = vmatprep.mubr.f32.mxu1 %v817_v8 }
 0x1c0   : > { %v769_v9 = vpop.permute.xlu1 %768  ;;  %v809_v22 = vpop.permute.xlu0 %808 }
 0x1c1   : > { %v818_v10 = vmul.f32 %v1324_v48, %v769_v9  ;;  %v826_v25 = vmul.f32 %v1336_v56, %v809_v22 }
 0x1c3   : > { %1379 = vmatmul.mubr.f32.gmra.mrb[6].mxu1 %v818_v10 }
 0x1c4   : > { %v774_v12 = vpop.permute.xlu1 %773 }
 0x1c5   : > { %v819_v13 = vmul.f32 %v774_v12, %v593_v51 }
 0x1c7   : > { %1381 = vmatprep.mubr.f32.mxu1 %v819_v13 }
 0x1c8   : > { %v784_v15 = vpop.permute.xlu1 %783  ;;  %1382 = vmatmul.mubr.f32.gmra.mrb[8].mxu1 %v820_v14 }
 0x1c9   : > { %v821_v17 = vmul.f32 %v784_v15, %v603_v53 }
 0x1cb   : > { %1384 = vmatprep.mubr.f32.mxu1 %v821_v17 }
 0x1cc   : > { %v794_v19 = vpop.permute.xlu1 %793  ;;  %1385 = vmatmul.mubr.f32.gmra.mrb[10].mxu1 %v822_v18 }
 0x1cd   : > { %v823_v20 = vmul.f32 %v794_v19, %v613_v55 }
 0x1cf   : > { %1387 = vmatprep.mubr.f32.mxu1 %v823_v20 }
 0x1d0   : > { %v804_v23 = vpop.permute.xlu1 %803  ;;  %1388 = vmatmul.mubr.f32.gmra.mrb[12].mxu1 %v824_v21 }
 0x1d1   : > { %v825_v24 = vmul.f32 %v804_v23, %v623_v57 }
 0x1d3   : > { %1390 = vmatprep.mubr.f32.mxu1 %v825_v24 }
 0x1d4   : > { %1391 = vmatmul.mubr.f32.gmra.mrb[14].mxu1 %v826_v25 }
 0x27e   : > { %v1371_v27 = vpop.f32.mrb[0].mxu1 }
 0x27f   : > { %v922_v28 = vadd.f32 %v1371_v27, %v1169_v26  ;;  %v916_v29 = vpop.f32.mrb[1].mxu1 }
 0x280   : > { %v917_v30 = vadd.f32 %v1169_v26, %v916_v29 }
 0x281   : > { %996 = vst [vmem:[%s2110_s10 + $0x8] sm:$0xff] %v922_v28 }
 0x282   : > { %995 = vst [vmem:[%s2110_s10] sm:$0xff] %v917_v30 }
 0x286   : > { %v1374_v31 = vpop.f32.mrb[2].mxu1 }
 0x287   : > { %v932_v32 = vadd.f32 %v1374_v31, %v1169_v26  ;;  %v926_v33 = vpop.f32.mrb[3].mxu1 }
 0x288   : > { %v927_v34 = vadd.f32 %v1169_v26, %v926_v33 }
 0x289   : > { %998 = vst [vmem:[%s2110_s10 + $0x18] sm:$0xff] %v932_v32 }
 0x28a   : > { %997 = vst [vmem:[%s2110_s10 + $0x10] sm:$0xff] %v927_v34 }
 0x28e   : > { %v1377_v35 = vpop.f32.mrb[4].mxu1 }
 0x28f   : > { %v942_v36 = vadd.f32 %v1377_v35, %v1169_v26  ;;  %v936_v37 = vpop.f32.mrb[5].mxu1 }
 0x290   : > { %v937_v38 = vadd.f32 %v1169_v26, %v936_v37 }
 0x291   : > { %1000 = vst [vmem:[%s2110_s10 + $0x28] sm:$0xff] %v942_v36 }
 0x292   : > { %999 = vst [vmem:[%s2110_s10 + $0x20] sm:$0xff] %v937_v38 }
 0x296   : > { %v1380_v39 = vpop.f32.mrb[6].mxu1 }
 0x297   : > { %v952_v40 = vadd.f32 %v1380_v39, %v1169_v26  ;;  %v946_v41 = vpop.f32.mrb[7].mxu1 }
 0x298   : > { %v947_v42 = vadd.f32 %v1169_v26, %v946_v41 }
 0x299   : > { %1002 = vst [vmem:[%s2110_s10 + $0x38] sm:$0xff] %v952_v40 }
 0x29a   : > { %1001 = vst [vmem:[%s2110_s10 + $0x30] sm:$0xff] %v947_v42 }
 0x29b   : > { %v1383_v43 = vpop.f32.mrb[8].mxu1 }
 0x29c   : > { %v962_v44 = vadd.f32 %v1383_v43, %v1169_v26  ;;  %v956_v45 = vpop.f32.mrb[9].mxu1 }
 0x29d   : > { %v957_v46 = vadd.f32 %v1169_v26, %v956_v45 }
 0x29e   : > { %1004 = vst [vmem:[%s2110_s10 + $0x48] sm:$0xff] %v962_v44 }
 0x29f   : > { %1003 = vst [vmem:[%s2110_s10 + $0x40] sm:$0xff] %v957_v46  ;;  %v1386_v47 = vpop.f32.mrb[10].mxu1 }
 0x2a0   : > { %v972_v48 = vadd.f32 %v1386_v47, %v1169_v26  ;;  %v966_v49 = vpop.f32.mrb[11].mxu1 }
 0x2a1   : > { %v967_v50 = vadd.f32 %v1169_v26, %v966_v49 }
 0x2a2   : > { %1006 = vst [vmem:[%s2110_s10 + $0x58] sm:$0xff] %v972_v48 }
 0x2a3   : > { %1005 = vst [vmem:[%s2110_s10 + $0x50] sm:$0xff] %v967_v50  ;;  %v1389_v51 = vpop.f32.mrb[12].mxu1 }
 0x2a4   : > { %v982_v52 = vadd.f32 %v1389_v51, %v1169_v26  ;;  %v976_v53 = vpop.f32.mrb[13].mxu1 }
 0x2a5   : > { %v977_v54 = vadd.f32 %v1169_v26, %v976_v53 }
 0x2a6   : > { %1008 = vst [vmem:[%s2110_s10 + $0x68] sm:$0xff] %v982_v52 }
 0x2a7   : > { %1007 = vst [vmem:[%s2110_s10 + $0x60] sm:$0xff] %v977_v54  ;;  %v1392_v55 = vpop.f32.mrb[14].mxu1 }
 0x2a8   : > { %v992_v56 = vadd.f32 %v1392_v55, %v1169_v26  ;;  %v986_v57 = vpop.f32.mrb[15].mxu1 }
 0x2a9   : > { %v987_v58 = vadd.f32 %v1169_v26, %v986_v57 }
 0x2aa   : > { %1010 = vst [vmem:[%s2110_s10 + $0x78] sm:$0xff] %v992_v56 }
 0x2ab   : > { %1009 = vst [vmem:[%s2110_s10 + $0x70] sm:$0xff] %v987_v58 }
 0x2ac   : > { %1678 = shalt.err (!%p1675_p8)
}
 0x2ad   : > { %s1679_s13 = scalar_lea.hbm %s2131_s26, 2048  ;;  %s1683_s0 = scalar_lea.hbm %s2188_s4, 4096 }
 0x2ae   : > { %p1680_p11 = scmp.ne.s32.totalorder %s2131_s26, %s1679_s13  ;;  %p1684_p6 = scmp.lt.u32.totalorder %s2131_s26, %s2188_s4 }
 0x2af   : > { %p1685_p13 = scmp.lt.u32.totalorder %s1683_s0, %s1679_s13  ;;  %p1687_p5 = scmp.lt.u32.totalorder %s1679_s13, %s2131_s26 }
 0x2b0   : > { %p1681_p12 = pnand %p1680_p11, %p1889_p10 }
 0x2b1   : > { %p1686_p0 = por %p1685_p13, %p1684_p6 }
 0x2b2   : > { %p1682_p3 = pneg %p1681_p12 }
 0x2b3   : > { %p1688_p9 = por %p1687_p5, %p1686_p0 }
 0x2b5   : > { %p1689_p1 = pnand %p1688_p9, %p1682_p3 }
 0x2b7   : > { %1692 = shalt.err (!%p1689_p1)
}
 0x2b8   : > { %s1767_s5 = smov 128   ;;  %s1768_s21 = smov 8  }
 0x2b9   : > { %1465 = dma.vmem_to_hbm [thread:$0]  (%p1889_p10), %s2133_s22, 2048, %s2131_s26, %s1012_s18, %s1767_s5, %s1767_s5, %s1768_s21  }
 0x2ba PF: > { %s1042_s23 = sand.u32 1, %s1735_s15   ;;  %p2216_p2 = scmp.ne.s32.totalorder %s2198_s24, 0 }
 0x2bb   : > { %p2217_p7 = scmp.ge.s32.totalorder %s1755_s20, 2  ;;  %s1043_s10 = scalar_lea.sflag [#allocation6], %s1042_s23 }
 0x2bd   : > { %p1479_p4 = pnand %p2217_p7, %p2216_p2 }
 0x2bf   : > { %1730 = dma.done.wait (!%p1479_p4), %s1043_s10, 2048  }
 0x2c0   : > { %1732 = vsyncadd (!%p1479_p4), %s1043_s10, 4294965248  ;;  %s23_s20 = sadd.s32 1, %s1755_s20   ;;  %s2218_s11 = sld [smem:[#allocation16_spill]] }
 0x2c1   : > { %p20_p8 = scmp.ge.s32.totalorder %s23_s20, 4   ;;  %s2219_s28 = sld [smem:[#allocation15_spill]] }
 0x2c2   : > { %s2220_s15 = smov %s1739_s16  ;;  %s2221_s16 = smov %s1743_s17 }
 0x2c3   : > { %s2223_s18 = smov %s1751_s19  ;;  %22 = sbr.rel (!%p20_p8) target bundleno = 11 (0xb), region = 106 }
 0x2c6   : > { %s2222_s17 = smov %s2218_s11 }
 0x2c7   : > { %s2224_s19 = smov %s2219_s28 }
 0x2ca   :  { %1048 = vsyncpa [#allocation5], 1 }
 0x2cb   :  { %1050 = vsyncpa [#allocation5 + $0x1], 1 }
 0x2cc   :  { %1051 = vsyncpa [#allocation8], 1 }
 0x2cd   :  { %1053 = vsyncpa [#allocation8 + $0x1], 1 }
 0x2ce   :  { %1054 = vsyncpa [#allocation6], 1 }
 0x2cf   :  { %1056 = vsyncpa [#allocation6 + $0x1], 1 }

</bundles_post_ra>
